<compile_context>
chip_gen: v6e
topology: v6e:2x2x1
jax: 0.10.0
libtpu: 0.0.40
codegen_flags: <defaults>
</compile_context>

<pallas_src>
from functools import partial

import jax
import jax.numpy as jnp
from jax.experimental import pallas as pl
from jax.experimental.pallas import tpu as pltpu

LN_EPS = 1e-5                      # torch.nn.LayerNorm default
_SQRT_2_OVER_PI = 0.7978845608028654
_NEG_BIG = -1e30                   # key-padding mask bias


# --------------------------------------------------------------------- helpers
def _layernorm(x, w, b):
    mean = jnp.mean(x, axis=-1, keepdims=True)
    xc = x - mean
    var = jnp.mean(xc * xc, axis=-1, keepdims=True)
    return xc * jax.lax.rsqrt(var + LN_EPS) * w + b


def _gelu_tanh(x):
    # tanh-approximation GELU (same formula as jax.nn.gelu(approximate=True)).
    # ~1e-3 deviation vs torch's exact erf GELU, accepted in the perf review.
    return 0.5 * x * (1.0 + jnp.tanh(_SQRT_2_OVER_PI * (x + 0.044715 * x * x * x)))


def _softmax_rows(s):
    # s: (..., N) f32.  Max-subtracted, approx-reciprocal denominator (EUP slot).
    m = jnp.max(s, axis=-1, keepdims=True)
    e = jnp.exp(s - m)
    return e * pl.reciprocal(jnp.sum(e, axis=-1, keepdims=True), approx=True)


def _attention(x, lnw, lnb, qkvw, projw, projb, heads_scr, num_heads, n_valid):
    """Attention(LayerNorm(x)) for a (Bb, Np, C) f32 block -> (Bb, Np, C) f32.

    qkvw: (C, 3C) bf16, projw: (C, C) bf16, projb: (1, C) f32.
    heads_scr: (Bb*Np, C) bf16 VMEM scratch used to concatenate per-head
    outputs so a single K=C projection matmul can be issued.
    """
    Bb, Np, C = x.shape
    hd = C // num_heads
    scale = hd ** (-0.5)

    xn = _layernorm(x, lnw, lnb).reshape(Bb * Np, C)
    qkv = jnp.dot(xn.astype(jnp.bfloat16), qkvw,
                  preferred_element_type=jnp.float32)                # (Bb*Np, 3C)

    # One wide scale+cast instead of 3*num_heads strided per-head casts.
    q_all = (qkv[:, :C] * scale).astype(jnp.bfloat16)
    k_all = qkv[:, C:2 * C].astype(jnp.bfloat16)
    v_all = qkv[:, 2 * C:].astype(jnp.bfloat16)

    if n_valid < Np:
        key_ids = jax.lax.broadcasted_iota(jnp.int32, (1, 1, Np), 2)
        key_bias = jnp.where(key_ids < n_valid, 0.0, _NEG_BIG)       # (1,1,Np) f32
    else:
        key_bias = None

    # TODO(synk): convert this static head loop into a lax.fori_loop over a qkv
    # VMEM scratch (pl.ds lane-offset slicing) once dynamic lane-offset ref
    # reads are verified on the target jax version; the heads_scr stores
    # already bound each head's live range, so the unrolled form no longer
    # keeps every head's scores/probs resident at once.
    for h in range(num_heads):
        lo = h * hd
        qh = q_all[:, lo:lo + hd].reshape(Bb, Np, hd)
        kh = k_all[:, lo:lo + hd].reshape(Bb, Np, hd)
        vh = v_all[:, lo:lo + hd].reshape(Bb, Np, hd)

        s = jnp.einsum('bqd,bkd->bqk', qh, kh,
                       preferred_element_type=jnp.float32)           # (Bb,Np,Np)
        if key_bias is not None:
            s = s + key_bias
        p = _softmax_rows(s)
        oh = jnp.einsum('bqk,bkd->bqd', p.astype(jnp.bfloat16), vh,
                        preferred_element_type=jnp.float32)          # (Bb,Np,hd)
        heads_scr[:, lo:lo + hd] = oh.reshape(Bb * Np, hd).astype(jnp.bfloat16)

    # Single lane-dense K=C output projection over all heads (fills the MXU).
    y = jnp.dot(heads_scr[...], projw, preferred_element_type=jnp.float32) + projb
    return y.reshape(Bb, Np, C)


def _mlp(x, lnw, lnb, w1, b1, w2, b2):
    """Mlp(LayerNorm(x)) for a (Bb, Np, C) f32 block -> (Bb, Np, C) f32."""
    Bb, Np, C = x.shape
    xn = _layernorm(x, lnw, lnb).reshape(Bb * Np, C)
    h = jnp.dot(xn.astype(jnp.bfloat16), w1,
                preferred_element_type=jnp.float32) + b1
    h = _gelu_tanh(h)
    y = jnp.dot(h.astype(jnp.bfloat16), w2,
                preferred_element_type=jnp.float32) + b2
    return y.reshape(Bb, Np, C)


# --------------------------------------------------------------------- kernels
def _attn_pair_kernel(num_heads, n_valid, x_ref,
                      lnw_a, lnb_a, qkvw_a, projw_a, projb_a, g_a,
                      lnw_b, lnb_b, qkvw_b, projw_b, projb_b, g_b,
                      o_ref, heads_scr):
    """o = x + g_a*Attn_a(LN_a(x)) + g_b*Attn_b(LN_b(x)); residual stays in VMEM."""
    x = x_ref[...].astype(jnp.float32)                               # (Bb, Np, C)
    out = x
    out = out + g_a[...] * _attention(x, lnw_a[...], lnb_a[...], qkvw_a[...],
                                      projw_a[...], projb_a[...], heads_scr,
                                      num_heads, n_valid)
    out = out + g_b[...] * _attention(x, lnw_b[...], lnb_b[...], qkvw_b[...],
                                      projw_b[...], projb_b[...], heads_scr,
                                      num_heads, n_valid)
    o_ref[...] = out.astype(o_ref.dtype)


def _mlp_pair_kernel(x_ref,
                     lnw_a, lnb_a, w1_a, b1_a, w2_a, b2_a, g_a,
                     lnw_b, lnb_b, w1_b, b1_b, w2_b, b2_b, g_b,
                     o_ref):
    """o = x + g_a*Mlp_a(LN_a(x)) + g_b*Mlp_b(LN_b(x)); residual stays in VMEM."""
    x = x_ref[...].astype(jnp.float32)
    out = x
    out = out + g_a[...] * _mlp(x, lnw_a[...], lnb_a[...], w1_a[...], b1_a[...],
                                w2_a[...], b2_a[...])
    out = out + g_b[...] * _mlp(x, lnw_b[...], lnb_b[...], w1_b[...], b1_b[...],
                                w2_b[...], b2_b[...])
    o_ref[...] = out.astype(o_ref.dtype)


# -------------------------------------------------------------------- wrappers
def _nbytes(a):
    return a.size * a.dtype.itemsize


def _vmem_capacity_bytes():
    try:
        cap = int(getattr(pltpu.get_tpu_info(), "vmem_capacity_bytes", 0))
        if cap > 0:
            return cap
    except Exception:
        pass
    return 64 << 20                 # conservative default (v7x per-TC VMEM)


def _attn_interm_row_bytes(C, Np):
    # f32 qkv (3C) + bf16 q/k/v (3C) + bf16 xn (C) + bf16 heads scratch (C)
    # + live-head f32 scores/probs (~3*Np) + f32 branch output (C)
    return 3 * C * 4 + 3 * C * 2 + C * 2 + C * 2 + 3 * Np * 4 + C * 4


def _mlp_interm_row_bytes(C, hidden):
    # f32 hidden + bf16 hidden + bf16 xn + f32 branch output (one branch live)
    return hidden * 4 + hidden * 2 + C * 2 + C * 4


def _pick_block_b(B, per_batch_bytes, fixed_bytes, budget_bytes):
    """Largest batch-block that divides B and fits the VMEM budget; prefer a
    grid that is even and >= 2 (keeps both v7x TensorCores busy), then >= 2."""
    divs = [d for d in range(1, B + 1)
            if B % d == 0 and fixed_bytes + d * per_batch_bytes <= budget_bytes]
    if not divs:
        return 1
    even = [d for d in divs if B // d >= 2 and (B // d) % 2 == 0]
    if even:
        return max(even)
    multi = [d for d in divs if B // d >= 2]
    return max(multi) if multi else max(divs)


def _rep_spec(p):
    # Full-array block with a constant index_map: DMA'd once, stays resident in
    # VMEM for the whole grid (only the allocation is 2x).
    # TODO(synk): single-buffer via pipeline_mode=pl.Buffered(1) once verified
    # on the target jax version (halves resident-weight VMEM, matters on v7x).
    nd = p.ndim
    return pl.BlockSpec(p.shape, lambda b, _nd=nd: (0,) * _nd)


def _pair_call(kernel_fn, x, params_a, params_b, interm_row_bytes,
               scratch_builder=None):
    B, Np, C = x.shape
    params = list(params_a) + list(params_b)

    w_bytes = sum(_nbytes(p) for p in params)
    cap = _vmem_capacity_bytes()
    # in + out activation blocks are double-buffered (2 copies each) plus the
    # real in-kernel intermediates per token row.
    per_batch = Np * C * x.dtype.itemsize * 4 + Np * interm_row_bytes
    fixed = 2 * w_bytes + (4 << 20)           # 2x-buffered weights + headroom
    bb = _pick_block_b(B, per_batch, fixed, int(0.72 * cap))

    vmem_limit = int(min(max(fixed + bb * per_batch + (4 << 20), 32 << 20),
                         int(0.9 * cap)))

    scratch_shapes = scratch_builder(bb, Np) if scratch_builder is not None else []

    xspec = pl.BlockSpec((bb, Np, C), lambda b: (b, 0, 0))
    return pl.pallas_call(
        kernel_fn,
        out_shape=jax.ShapeDtypeStruct((B, Np, C), x.dtype),
        grid_spec=pltpu.PrefetchScalarGridSpec(
            num_scalar_prefetch=0,
            grid=(B // bb,),
            in_specs=[xspec] + [_rep_spec(p) for p in params],
            out_specs=xspec,
            scratch_shapes=scratch_shapes,
        ),
        compiler_params=pltpu.CompilerParams(
            dimension_semantics=("parallel",),
            vmem_limit_bytes=vmem_limit,
        ),
    )(x, *params)


def _round_up(n, m):
    return ((n + m - 1) // m) * m


def _padded_seq_len(N):
    # Lane-dense key axis for the attention scores: pad to 128 when the
    # sequence is big enough to care, otherwise just to a sublane multiple.
    if N % 128 == 0:
        return N
    return _round_up(N, 128) if N >= 64 else _round_up(N, 8)


def layer_scale_block_paralx2(x, params):
    nh = params["num_heads"]
    B, N, C = x.shape
    hidden = params["mlp"][2].shape[1]

    Np = _padded_seq_len(N)
    xp = jnp.pad(x, ((0, 0), (0, Np - N), (0, 0))) if Np != N else x

    attn_scratch = lambda bb, n: [pltpu.VMEM((bb * n, C), jnp.bfloat16)]

    # x = x + g1*attn(norm1(x)) + g1_1*attn1(norm11(x))     -- one fused kernel
    y = _pair_call(partial(_attn_pair_kernel, nh, N), xp,
                   params["attn"], params["attn1"],
                   _attn_interm_row_bytes(C, Np), attn_scratch)
    # x = x + g2*mlp(norm2(x))  + g2_1*mlp1(norm21(x))      -- one fused kernel
    z = _pair_call(_mlp_pair_kernel, y, params["mlp"], params["mlp1"],
                   _mlp_interm_row_bytes(C, hidden))
    # TODO(synk): optional v6e/v5e path fusing the attn+mlp pairs into a single
    # pallas_call (residual never leaves VMEM); needs single-buffered weights
    # to also fit v7x's 64 MiB VMEM, so it is kept as a follow-up.
    return z[:, :N, :] if Np != N else z


# ---------------------------------------------------------------------- params
def init_params(key, dim, num_heads, mlp_ratio=4.0, init_values=1e-4):
    hidden = int(dim * mlp_ratio)
    ks = jax.random.split(key, 16)

    def mxu_w(k, shape, scale=0.02):
        # MXU operand: stored in bf16 (halves HBM traffic and VMEM footprint).
        return (scale * jax.random.normal(k, shape)).astype(jnp.bfloat16)

    def vec(k, n, scale=0.02):
        return (scale * jax.random.normal(k, (1, n))).astype(jnp.float32)

    ones = jnp.ones((1, dim), jnp.float32)        # LayerNorm weight (torch default)
    zeros = jnp.zeros((1, dim), jnp.float32)      # LayerNorm bias   (torch default)
    gamma = jnp.full((1, dim), init_values, jnp.float32)

    # attention branch: (ln_w, ln_b, qkv_w(C,3C), proj_w(C,C), proj_b(1,C), gamma)
    attn = (ones, zeros, mxu_w(ks[0], (dim, 3 * dim)),
            mxu_w(ks[1], (dim, dim)), vec(ks[2], dim), gamma)
    attn1 = (ones, zeros, mxu_w(ks[3], (dim, 3 * dim)),
             mxu_w(ks[4], (dim, dim)), vec(ks[5], dim), gamma)
    # mlp branch: (ln_w, ln_b, w1(C,H), b1(1,H), w2(H,C), b2(1,C), gamma)
    mlp = (ones, zeros, mxu_w(ks[6], (dim, hidden)), vec(ks[7], hidden),
           mxu_w(ks[8], (hidden, dim)), vec(ks[9], dim), gamma)
    mlp1 = (ones, zeros, mxu_w(ks[10], (dim, hidden)), vec(ks[11], hidden),
            mxu_w(ks[12], (hidden, dim)), vec(ks[13], dim), gamma)

    return {"num_heads": num_heads, "attn": attn, "attn1": attn1,
            "mlp": mlp, "mlp1": mlp1}


# ------------------------------------------------------------------- reference
def reference_forward(x, params):
    """Pure-JAX (non-Pallas) forward in f32, using the same bf16-valued weights
    and the same tanh GELU, for a correctness cross-check of the kernels."""
    nh = params["num_heads"]

    def ln(t, w, b):
        m = jnp.mean(t, -1, keepdims=True)
        v = jnp.mean((t - m) ** 2, -1, keepdims=True)
        return (t - m) / jnp.sqrt(v + LN_EPS) * w + b

    def attn(t, p):
        lnw, lnb, qkvw, projw, projb, g = p
        B, N, C = t.shape
        hd = C // nh
        qkv = ln(t, lnw, lnb) @ qkvw.astype(jnp.float32)                 # (B,N,3C)
        q, k, v = qkv[..., :C], qkv[..., C:2 * C], qkv[..., 2 * C:]
        q = q * hd ** (-0.5)

        def split(u):                                                    # (B,H,N,hd)
            return u.reshape(B, N, nh, hd).transpose(0, 2, 1, 3)

        q, k, v = split(q), split(k), split(v)
        s = jnp.einsum('bhqd,bhkd->bhqk', q, k)
        pr = jax.nn.softmax(s, axis=-1)
        o = jnp.einsum('bhqk,bhkd->bhqd', pr, v)
        o = o.transpose(0, 2, 1, 3).reshape(B, N, C)
        return g * (o @ projw.astype(jnp.float32) + projb)

    def mlp(t, p):
        lnw, lnb, w1, b1, w2, b2, g = p
        h = ln(t, lnw, lnb) @ w1.astype(jnp.float32) + b1
        h = 0.5 * h * (1.0 + jnp.tanh(_SQRT_2_OVER_PI * (h + 0.044715 * h ** 3)))
        return g * (h @ w2.astype(jnp.float32) + b2)

    y = x + attn(x, params["attn"]) + attn(x, params["attn1"])
    return y + mlp(y, params["mlp"]) + mlp(y, params["mlp1"])


# ------------------------------------------------------------------------ main
if __name__ == "__main__":
    B, N, C = 2, 8, 32          # batch, sequence, embed dim
    num_heads = 4               # head_dim = 8

    key = jax.random.PRNGKey(0)
    kx, kp, kx2 = jax.random.split(key, 3)
    x = jax.random.normal(kx, (B, N, C), jnp.float32)
    params = init_params(kp, C, num_heads)

    fwd = jax.jit(lambda xx: layer_scale_block_paralx2(xx, params))
    out = fwd(x)
    jax.block_until_ready(out)

    assert out.shape == (B, N, C) and out.dtype == jnp.float32
    assert bool(jnp.all(jnp.isfinite(out)))

    ref = reference_forward(x, params)
    err = float(jnp.max(jnp.abs(out - ref)))
    assert err < 5e-3, f"kernel deviates from reference: max abs err {err}"

    # Second shape exercises the sequence-padding + key-mask path (N=12 -> 16).
    N2 = 12
    x2 = jax.random.normal(kx2, (B, N2, C), jnp.float32)
    out2 = jax.jit(lambda xx: layer_scale_block_paralx2(xx, params))(x2)
    jax.block_until_ready(out2)
    ref2 = reference_forward(x2, params)
    err2 = float(jnp.max(jnp.abs(out2 - ref2)))
    assert out2.shape == (B, N2, C) and bool(jnp.all(jnp.isfinite(out2)))
    assert err2 < 5e-3, f"padded-path kernel deviates from reference: {err2}"

    print("KERNEL_OK")
</pallas_src>

<mosaic_0001>
module attributes {stable_mosaic.version = 11 : i64} {
  func.func @_attn_pair_kernel(%arg0: i32, %arg1: memref<1x8x32xf32, #tpu.memory_space<vmem>>, %arg2: memref<1x32xf32, #tpu.memory_space<vmem>>, %arg3: memref<1x32xf32, #tpu.memory_space<vmem>>, %arg4: memref<32x96xbf16, #tpu.memory_space<vmem>>, %arg5: memref<32x32xbf16, #tpu.memory_space<vmem>>, %arg6: memref<1x32xf32, #tpu.memory_space<vmem>>, %arg7: memref<1x32xf32, #tpu.memory_space<vmem>>, %arg8: memref<1x32xf32, #tpu.memory_space<vmem>>, %arg9: memref<1x32xf32, #tpu.memory_space<vmem>>, %arg10: memref<32x96xbf16, #tpu.memory_space<vmem>>, %arg11: memref<32x32xbf16, #tpu.memory_space<vmem>>, %arg12: memref<1x32xf32, #tpu.memory_space<vmem>>, %arg13: memref<1x32xf32, #tpu.memory_space<vmem>>, %arg14: memref<1x8x32xf32, #tpu.memory_space<vmem>>, %arg15: memref<8x32xbf16, #tpu.memory_space<vmem>>) attributes {dimension_semantics = [#tpu.dimension_semantics<parallel>], iteration_bounds = array<i64: 2>, scalar_prefetch = 0 : i64, scratch_operands = 1 : i64, tpu.core_type = #tpu.core_type<tc>, window_params = [{transform_indices = @transform_0, window_bounds = array<i64: 1, 8, 32>}, {pipeline_mode = #tpu.pipeline_mode<synchronous>, transform_indices = @transform_1, window_bounds = array<i64: 1, 32>}, {pipeline_mode = #tpu.pipeline_mode<synchronous>, transform_indices = @transform_2, window_bounds = array<i64: 1, 32>}, {pipeline_mode = #tpu.pipeline_mode<synchronous>, transform_indices = @transform_3, window_bounds = array<i64: 32, 96>}, {pipeline_mode = #tpu.pipeline_mode<synchronous>, transform_indices = @transform_4, window_bounds = array<i64: 32, 32>}, {pipeline_mode = #tpu.pipeline_mode<synchronous>, transform_indices = @transform_5, window_bounds = array<i64: 1, 32>}, {pipeline_mode = #tpu.pipeline_mode<synchronous>, transform_indices = @transform_6, window_bounds = array<i64: 1, 32>}, {pipeline_mode = #tpu.pipeline_mode<synchronous>, transform_indices = @transform_7, window_bounds = array<i64: 1, 32>}, {pipeline_mode = #tpu.pipeline_mode<synchronous>, transform_indices = @transform_8, window_bounds = array<i64: 1, 32>}, {pipeline_mode = #tpu.pipeline_mode<synchronous>, transform_indices = @transform_9, window_bounds = array<i64: 32, 96>}, {pipeline_mode = #tpu.pipeline_mode<synchronous>, transform_indices = @transform_10, window_bounds = array<i64: 32, 32>}, {pipeline_mode = #tpu.pipeline_mode<synchronous>, transform_indices = @transform_11, window_bounds = array<i64: 1, 32>}, {pipeline_mode = #tpu.pipeline_mode<synchronous>, transform_indices = @transform_12, window_bounds = array<i64: 1, 32>}, {transform_indices = @transform_13, window_bounds = array<i64: 1, 8, 32>}]} {
    %c0 = arith.constant 0 : index
    %c0_0 = arith.constant 0 : index
    %c0_1 = arith.constant 0 : index
    %0 = vector.load %arg1[%c0, %c0_0, %c0_1] : memref<1x8x32xf32, #tpu.memory_space<vmem>>, vector<1x8x32xf32>
    %c0_2 = arith.constant 0 : index
    %c0_3 = arith.constant 0 : index
    %1 = vector.load %arg7[%c0_2, %c0_3] : memref<1x32xf32, #tpu.memory_space<vmem>>, vector<1x32xf32>
    %c0_4 = arith.constant 0 : index
    %c0_5 = arith.constant 0 : index
    %2 = vector.load %arg2[%c0_4, %c0_5] : memref<1x32xf32, #tpu.memory_space<vmem>>, vector<1x32xf32>
    %c0_6 = arith.constant 0 : index
    %c0_7 = arith.constant 0 : index
    %3 = vector.load %arg3[%c0_6, %c0_7] : memref<1x32xf32, #tpu.memory_space<vmem>>, vector<1x32xf32>
    %c0_8 = arith.constant 0 : index
    %c0_9 = arith.constant 0 : index
    %4 = vector.load %arg4[%c0_8, %c0_9] : memref<32x96xbf16, #tpu.memory_space<vmem>>, vector<32x96xbf16>
    %c0_10 = arith.constant 0 : index
    %c0_11 = arith.constant 0 : index
    %5 = vector.load %arg5[%c0_10, %c0_11] : memref<32x32xbf16, #tpu.memory_space<vmem>>, vector<32x32xbf16>
    %c0_12 = arith.constant 0 : index
    %c0_13 = arith.constant 0 : index
    %6 = vector.load %arg6[%c0_12, %c0_13] : memref<1x32xf32, #tpu.memory_space<vmem>>, vector<1x32xf32>
    %cst = arith.constant dense<0.000000e+00> : vector<1x8xf32>
    %7 = vector.multi_reduction <add>, %0, %cst [2] : vector<1x8x32xf32> to vector<1x8xf32>
    %8 = vector.shape_cast %7 : vector<1x8xf32> to vector<1x8x1xf32>
    %cst_14 = arith.constant 3.200000e+01 : f32
    %9 = vector.broadcast %cst_14 : f32 to vector<1x8x1xf32>
    %10 = arith.divf %8, %9 : vector<1x8x1xf32>
    %11 = vector.broadcast %10 : vector<1x8x1xf32> to vector<1x8x32xf32>
    %12 = arith.subf %0, %11 : vector<1x8x32xf32>
    %13 = arith.mulf %12, %12 : vector<1x8x32xf32>
    %cst_15 = arith.constant dense<0.000000e+00> : vector<1x8xf32>
    %14 = vector.multi_reduction <add>, %13, %cst_15 [2] : vector<1x8x32xf32> to vector<1x8xf32>
    %15 = vector.shape_cast %14 : vector<1x8xf32> to vector<1x8x1xf32>
    %cst_16 = arith.constant 3.200000e+01 : f32
    %16 = vector.broadcast %cst_16 : f32 to vector<1x8x1xf32>
    %17 = arith.divf %15, %16 : vector<1x8x1xf32>
    %cst_17 = arith.constant 9.99999974E-6 : f32
    %18 = vector.broadcast %cst_17 : f32 to vector<1x8x1xf32>
    %19 = arith.addf %17, %18 : vector<1x8x1xf32>
    %20 = math.rsqrt %19 : vector<1x8x1xf32>
    %21 = vector.broadcast %20 : vector<1x8x1xf32> to vector<1x8x32xf32>
    %22 = arith.mulf %12, %21 : vector<1x8x32xf32>
    %23 = vector.shape_cast %2 : vector<1x32xf32> to vector<1x1x32xf32>
    %24 = vector.broadcast %23 : vector<1x1x32xf32> to vector<1x8x32xf32>
    %25 = arith.mulf %22, %24 : vector<1x8x32xf32>
    %26 = vector.shape_cast %3 : vector<1x32xf32> to vector<1x1x32xf32>
    %27 = vector.broadcast %26 : vector<1x1x32xf32> to vector<1x8x32xf32>
    %28 = arith.addf %25, %27 : vector<1x8x32xf32>
    %29 = vector.shape_cast %28 : vector<1x8x32xf32> to vector<8x32xf32>
    %30 = arith.truncf %29 : vector<8x32xf32> to vector<8x32xbf16>
    %cst_18 = arith.constant dense<0.000000e+00> : vector<8x96xf32>
    %31 = tpu.matmul %30, %4, %cst_18 {dimension_numbers = #tpu.dot_dimension_numbers<[1], [0], [0], [1], [0, 0, 1, 1], [], []>} : vector<8x32xbf16>, vector<32x96xbf16>, vector<8x96xf32> -> vector<8x96xf32>
    %32 = vector.extract_strided_slice %31 {offsets = [0, 0], sizes = [8, 32], strides = [1, 1]} : vector<8x96xf32> to vector<8x32xf32>
    %cst_19 = arith.constant 0.353553385 : f32
    %33 = vector.broadcast %cst_19 : f32 to vector<8x32xf32>
    %34 = arith.mulf %32, %33 : vector<8x32xf32>
    %35 = arith.truncf %34 : vector<8x32xf32> to vector<8x32xbf16>
    %36 = vector.extract_strided_slice %31 {offsets = [0, 32], sizes = [8, 32], strides = [1, 1]} : vector<8x96xf32> to vector<8x32xf32>
    %37 = arith.truncf %36 : vector<8x32xf32> to vector<8x32xbf16>
    %38 = vector.extract_strided_slice %31 {offsets = [0, 64], sizes = [8, 32], strides = [1, 1]} : vector<8x96xf32> to vector<8x32xf32>
    %39 = arith.truncf %38 : vector<8x32xf32> to vector<8x32xbf16>
    %40 = vector.extract_strided_slice %35 {offsets = [0, 0], sizes = [8, 8], strides = [1, 1]} : vector<8x32xbf16> to vector<8x8xbf16>
    %41 = vector.shape_cast %40 : vector<8x8xbf16> to vector<1x8x8xbf16>
    %42 = vector.extract_strided_slice %37 {offsets = [0, 0], sizes = [8, 8], strides = [1, 1]} : vector<8x32xbf16> to vector<8x8xbf16>
    %43 = vector.shape_cast %42 : vector<8x8xbf16> to vector<1x8x8xbf16>
    %44 = vector.extract_strided_slice %39 {offsets = [0, 0], sizes = [8, 8], strides = [1, 1]} : vector<8x32xbf16> to vector<8x8xbf16>
    %45 = vector.shape_cast %44 : vector<8x8xbf16> to vector<1x8x8xbf16>
    "tpu.trace_start"() <{level = 10 : i32, message = "bqd,bkd->bqk"}> : () -> ()
    %cst_20 = arith.constant dense<0.000000e+00> : vector<1x8x8xf32>
    %46 = tpu.matmul %41, %43, %cst_20 {dimension_numbers = #tpu.dot_dimension_numbers<[2], [2], [1], [1], [0, 0, 0, 1, 1, 1], [0], [0]>} : vector<1x8x8xbf16>, vector<1x8x8xbf16>, vector<1x8x8xf32> -> vector<1x8x8xf32>
    "tpu.trace_stop"() : () -> ()
    %cst_21 = arith.constant dense<0xFF800000> : vector<1x8xf32>
    %47 = vector.multi_reduction <maximumf>, %46, %cst_21 [2] : vector<1x8x8xf32> to vector<1x8xf32>
    %48 = vector.shape_cast %47 : vector<1x8xf32> to vector<1x8x1xf32>
    %49 = vector.broadcast %48 : vector<1x8x1xf32> to vector<1x8x8xf32>
    %50 = arith.subf %46, %49 : vector<1x8x8xf32>
    %51 = math.exp %50 : vector<1x8x8xf32>
    %cst_22 = arith.constant dense<0.000000e+00> : vector<1x8xf32>
    %52 = vector.multi_reduction <add>, %51, %cst_22 [2] : vector<1x8x8xf32> to vector<1x8xf32>
    %53 = vector.shape_cast %52 : vector<1x8xf32> to vector<1x8x1xf32>
    %54 = tpu.reciprocal %53 {approx = true} : vector<1x8x1xf32> -> vector<1x8x1xf32>
    %55 = vector.broadcast %54 : vector<1x8x1xf32> to vector<1x8x8xf32>
    %56 = arith.mulf %51, %55 : vector<1x8x8xf32>
    %57 = arith.truncf %56 : vector<1x8x8xf32> to vector<1x8x8xbf16>
    "tpu.trace_start"() <{level = 10 : i32, message = "bqk,bkd->bqd"}> : () -> ()
    %cst_23 = arith.constant dense<0.000000e+00> : vector<1x8x8xf32>
    %58 = tpu.matmul %57, %45, %cst_23 {dimension_numbers = #tpu.dot_dimension_numbers<[2], [1], [1], [2], [0, 0, 0, 1, 1, 2], [0], [0]>} : vector<1x8x8xbf16>, vector<1x8x8xbf16>, vector<1x8x8xf32> -> vector<1x8x8xf32>
    "tpu.trace_stop"() : () -> ()
    %59 = vector.shape_cast %58 : vector<1x8x8xf32> to vector<8x8xf32>
    %60 = arith.truncf %59 : vector<8x8xf32> to vector<8x8xbf16>
    %c0_24 = arith.constant 0 : index
    %c0_25 = arith.constant 0 : index
    %61 = vector.load %arg15[%c0_24, %c0_25] : memref<8x32xbf16, #tpu.memory_space<vmem>>, vector<8x8xbf16>
    tpu.vector_store %arg15[%c0_24, %c0_25], %60 {strides = array<i32>} : memref<8x32xbf16, #tpu.memory_space<vmem>>, vector<8x8xbf16>,
    %62 = vector.extract_strided_slice %35 {offsets = [0, 8], sizes = [8, 8], strides = [1, 1]} : vector<8x32xbf16> to vector<8x8xbf16>
    %63 = vector.shape_cast %62 : vector<8x8xbf16> to vector<1x8x8xbf16>
    %64 = vector.extract_strided_slice %37 {offsets = [0, 8], sizes = [8, 8], strides = [1, 1]} : vector<8x32xbf16> to vector<8x8xbf16>
    %65 = vector.shape_cast %64 : vector<8x8xbf16> to vector<1x8x8xbf16>
    %66 = vector.extract_strided_slice %39 {offsets = [0, 8], sizes = [8, 8], strides = [1, 1]} : vector<8x32xbf16> to vector<8x8xbf16>
    %67 = vector.shape_cast %66 : vector<8x8xbf16> to vector<1x8x8xbf16>
    "tpu.trace_start"() <{level = 10 : i32, message = "bqd,bkd->bqk"}> : () -> ()
    %cst_26 = arith.constant dense<0.000000e+00> : vector<1x8x8xf32>
    %68 = tpu.matmul %63, %65, %cst_26 {dimension_numbers = #tpu.dot_dimension_numbers<[2], [2], [1], [1], [0, 0, 0, 1, 1, 1], [0], [0]>} : vector<1x8x8xbf16>, vector<1x8x8xbf16>, vector<1x8x8xf32> -> vector<1x8x8xf32>
    "tpu.trace_stop"() : () -> ()
    %cst_27 = arith.constant dense<0xFF800000> : vector<1x8xf32>
    %69 = vector.multi_reduction <maximumf>, %68, %cst_27 [2] : vector<1x8x8xf32> to vector<1x8xf32>
    %70 = vector.shape_cast %69 : vector<1x8xf32> to vector<1x8x1xf32>
    %71 = vector.broadcast %70 : vector<1x8x1xf32> to vector<1x8x8xf32>
    %72 = arith.subf %68, %71 : vector<1x8x8xf32>
    %73 = math.exp %72 : vector<1x8x8xf32>
    %cst_28 = arith.constant dense<0.000000e+00> : vector<1x8xf32>
    %74 = vector.multi_reduction <add>, %73, %cst_28 [2] : vector<1x8x8xf32> to vector<1x8xf32>
    %75 = vector.shape_cast %74 : vector<1x8xf32> to vector<1x8x1xf32>
    %76 = tpu.reciprocal %75 {approx = true} : vector<1x8x1xf32> -> vector<1x8x1xf32>
    %77 = vector.broadcast %76 : vector<1x8x1xf32> to vector<1x8x8xf32>
    %78 = arith.mulf %73, %77 : vector<1x8x8xf32>
    %79 = arith.truncf %78 : vector<1x8x8xf32> to vector<1x8x8xbf16>
    "tpu.trace_start"() <{level = 10 : i32, message = "bqk,bkd->bqd"}> : () -> ()
    %cst_29 = arith.constant dense<0.000000e+00> : vector<1x8x8xf32>
    %80 = tpu.matmul %79, %67, %cst_29 {dimension_numbers = #tpu.dot_dimension_numbers<[2], [1], [1], [2], [0, 0, 0, 1, 1, 2], [0], [0]>} : vector<1x8x8xbf16>, vector<1x8x8xbf16>, vector<1x8x8xf32> -> vector<1x8x8xf32>
    "tpu.trace_stop"() : () -> ()
    %81 = vector.shape_cast %80 : vector<1x8x8xf32> to vector<8x8xf32>
    %82 = arith.truncf %81 : vector<8x8xf32> to vector<8x8xbf16>
    %c0_30 = arith.constant 0 : index
    %c8 = arith.constant 8 : index
    %83 = vector.load %arg15[%c0_30, %c8] : memref<8x32xbf16, #tpu.memory_space<vmem>>, vector<8x8xbf16>
    tpu.vector_store %arg15[%c0_30, %c8], %82 {strides = array<i32>} : memref<8x32xbf16, #tpu.memory_space<vmem>>, vector<8x8xbf16>,
    %84 = vector.extract_strided_slice %35 {offsets = [0, 16], sizes = [8, 8], strides = [1, 1]} : vector<8x32xbf16> to vector<8x8xbf16>
    %85 = vector.shape_cast %84 : vector<8x8xbf16> to vector<1x8x8xbf16>
    %86 = vector.extract_strided_slice %37 {offsets = [0, 16], sizes = [8, 8], strides = [1, 1]} : vector<8x32xbf16> to vector<8x8xbf16>
    %87 = vector.shape_cast %86 : vector<8x8xbf16> to vector<1x8x8xbf16>
    %88 = vector.extract_strided_slice %39 {offsets = [0, 16], sizes = [8, 8], strides = [1, 1]} : vector<8x32xbf16> to vector<8x8xbf16>
    %89 = vector.shape_cast %88 : vector<8x8xbf16> to vector<1x8x8xbf16>
    "tpu.trace_start"() <{level = 10 : i32, message = "bqd,bkd->bqk"}> : () -> ()
    %cst_31 = arith.constant dense<0.000000e+00> : vector<1x8x8xf32>
    %90 = tpu.matmul %85, %87, %cst_31 {dimension_numbers = #tpu.dot_dimension_numbers<[2], [2], [1], [1], [0, 0, 0, 1, 1, 1], [0], [0]>} : vector<1x8x8xbf16>, vector<1x8x8xbf16>, vector<1x8x8xf32> -> vector<1x8x8xf32>
    "tpu.trace_stop"() : () -> ()
    %cst_32 = arith.constant dense<0xFF800000> : vector<1x8xf32>
    %91 = vector.multi_reduction <maximumf>, %90, %cst_32 [2] : vector<1x8x8xf32> to vector<1x8xf32>
    %92 = vector.shape_cast %91 : vector<1x8xf32> to vector<1x8x1xf32>
    %93 = vector.broadcast %92 : vector<1x8x1xf32> to vector<1x8x8xf32>
    %94 = arith.subf %90, %93 : vector<1x8x8xf32>
    %95 = math.exp %94 : vector<1x8x8xf32>
    %cst_33 = arith.constant dense<0.000000e+00> : vector<1x8xf32>
    %96 = vector.multi_reduction <add>, %95, %cst_33 [2] : vector<1x8x8xf32> to vector<1x8xf32>
    %97 = vector.shape_cast %96 : vector<1x8xf32> to vector<1x8x1xf32>
    %98 = tpu.reciprocal %97 {approx = true} : vector<1x8x1xf32> -> vector<1x8x1xf32>
    %99 = vector.broadcast %98 : vector<1x8x1xf32> to vector<1x8x8xf32>
    %100 = arith.mulf %95, %99 : vector<1x8x8xf32>
    %101 = arith.truncf %100 : vector<1x8x8xf32> to vector<1x8x8xbf16>
    "tpu.trace_start"() <{level = 10 : i32, message = "bqk,bkd->bqd"}> : () -> ()
    %cst_34 = arith.constant dense<0.000000e+00> : vector<1x8x8xf32>
    %102 = tpu.matmul %101, %89, %cst_34 {dimension_numbers = #tpu.dot_dimension_numbers<[2], [1], [1], [2], [0, 0, 0, 1, 1, 2], [0], [0]>} : vector<1x8x8xbf16>, vector<1x8x8xbf16>, vector<1x8x8xf32> -> vector<1x8x8xf32>
    "tpu.trace_stop"() : () -> ()
    %103 = vector.shape_cast %102 : vector<1x8x8xf32> to vector<8x8xf32>
    %104 = arith.truncf %103 : vector<8x8xf32> to vector<8x8xbf16>
    %c0_35 = arith.constant 0 : index
    %c16 = arith.constant 16 : index
    %105 = vector.load %arg15[%c0_35, %c16] : memref<8x32xbf16, #tpu.memory_space<vmem>>, vector<8x8xbf16>
    tpu.vector_store %arg15[%c0_35, %c16], %104 {strides = array<i32>} : memref<8x32xbf16, #tpu.memory_space<vmem>>, vector<8x8xbf16>,
    %106 = vector.extract_strided_slice %35 {offsets = [0, 24], sizes = [8, 8], strides = [1, 1]} : vector<8x32xbf16> to vector<8x8xbf16>
    %107 = vector.shape_cast %106 : vector<8x8xbf16> to vector<1x8x8xbf16>
    %108 = vector.extract_strided_slice %37 {offsets = [0, 24], sizes = [8, 8], strides = [1, 1]} : vector<8x32xbf16> to vector<8x8xbf16>
    %109 = vector.shape_cast %108 : vector<8x8xbf16> to vector<1x8x8xbf16>
    %110 = vector.extract_strided_slice %39 {offsets = [0, 24], sizes = [8, 8], strides = [1, 1]} : vector<8x32xbf16> to vector<8x8xbf16>
    %111 = vector.shape_cast %110 : vector<8x8xbf16> to vector<1x8x8xbf16>
    "tpu.trace_start"() <{level = 10 : i32, message = "bqd,bkd->bqk"}> : () -> ()
    %cst_36 = arith.constant dense<0.000000e+00> : vector<1x8x8xf32>
    %112 = tpu.matmul %107, %109, %cst_36 {dimension_numbers = #tpu.dot_dimension_numbers<[2], [2], [1], [1], [0, 0, 0, 1, 1, 1], [0], [0]>} : vector<1x8x8xbf16>, vector<1x8x8xbf16>, vector<1x8x8xf32> -> vector<1x8x8xf32>
    "tpu.trace_stop"() : () -> ()
    %cst_37 = arith.constant dense<0xFF800000> : vector<1x8xf32>
    %113 = vector.multi_reduction <maximumf>, %112, %cst_37 [2] : vector<1x8x8xf32> to vector<1x8xf32>
    %114 = vector.shape_cast %113 : vector<1x8xf32> to vector<1x8x1xf32>
    %115 = vector.broadcast %114 : vector<1x8x1xf32> to vector<1x8x8xf32>
    %116 = arith.subf %112, %115 : vector<1x8x8xf32>
    %117 = math.exp %116 : vector<1x8x8xf32>
    %cst_38 = arith.constant dense<0.000000e+00> : vector<1x8xf32>
    %118 = vector.multi_reduction <add>, %117, %cst_38 [2] : vector<1x8x8xf32> to vector<1x8xf32>
    %119 = vector.shape_cast %118 : vector<1x8xf32> to vector<1x8x1xf32>
    %120 = tpu.reciprocal %119 {approx = true} : vector<1x8x1xf32> -> vector<1x8x1xf32>
    %121 = vector.broadcast %120 : vector<1x8x1xf32> to vector<1x8x8xf32>
    %122 = arith.mulf %117, %121 : vector<1x8x8xf32>
    %123 = arith.truncf %122 : vector<1x8x8xf32> to vector<1x8x8xbf16>
    "tpu.trace_start"() <{level = 10 : i32, message = "bqk,bkd->bqd"}> : () -> ()
    %cst_39 = arith.constant dense<0.000000e+00> : vector<1x8x8xf32>
    %124 = tpu.matmul %123, %111, %cst_39 {dimension_numbers = #tpu.dot_dimension_numbers<[2], [1], [1], [2], [0, 0, 0, 1, 1, 2], [0], [0]>} : vector<1x8x8xbf16>, vector<1x8x8xbf16>, vector<1x8x8xf32> -> vector<1x8x8xf32>
    "tpu.trace_stop"() : () -> ()
    %125 = vector.shape_cast %124 : vector<1x8x8xf32> to vector<8x8xf32>
    %126 = arith.truncf %125 : vector<8x8xf32> to vector<8x8xbf16>
    %c0_40 = arith.constant 0 : index
    %c24 = arith.constant 24 : index
    %127 = vector.load %arg15[%c0_40, %c24] : memref<8x32xbf16, #tpu.memory_space<vmem>>, vector<8x8xbf16>
    tpu.vector_store %arg15[%c0_40, %c24], %126 {strides = array<i32>} : memref<8x32xbf16, #tpu.memory_space<vmem>>, vector<8x8xbf16>,
    %c0_41 = arith.constant 0 : index
    %c0_42 = arith.constant 0 : index
    %128 = vector.load %arg15[%c0_41, %c0_42] : memref<8x32xbf16, #tpu.memory_space<vmem>>, vector<8x32xbf16>
    %cst_43 = arith.constant dense<0.000000e+00> : vector<8x32xf32>
    %129 = tpu.matmul %128, %5, %cst_43 {dimension_numbers = #tpu.dot_dimension_numbers<[1], [0], [0], [1], [0, 0, 1, 1], [], []>} : vector<8x32xbf16>, vector<32x32xbf16>, vector<8x32xf32> -> vector<8x32xf32>
    %130 = vector.broadcast %6 : vector<1x32xf32> to vector<8x32xf32>
    %131 = arith.addf %129, %130 : vector<8x32xf32>
    %132 = vector.shape_cast %131 : vector<8x32xf32> to vector<1x8x32xf32>
    %133 = vector.shape_cast %1 : vector<1x32xf32> to vector<1x1x32xf32>
    %134 = vector.broadcast %133 : vector<1x1x32xf32> to vector<1x8x32xf32>
    %135 = arith.mulf %134, %132 : vector<1x8x32xf32>
    %136 = arith.addf %0, %135 : vector<1x8x32xf32>
    %c0_44 = arith.constant 0 : index
    %c0_45 = arith.constant 0 : index
    %137 = vector.load %arg13[%c0_44, %c0_45] : memref<1x32xf32, #tpu.memory_space<vmem>>, vector<1x32xf32>
    %c0_46 = arith.constant 0 : index
    %c0_47 = arith.constant 0 : index
    %138 = vector.load %arg8[%c0_46, %c0_47] : memref<1x32xf32, #tpu.memory_space<vmem>>, vector<1x32xf32>
    %c0_48 = arith.constant 0 : index
    %c0_49 = arith.constant 0 : index
    %139 = vector.load %arg9[%c0_48, %c0_49] : memref<1x32xf32, #tpu.memory_space<vmem>>, vector<1x32xf32>
    %c0_50 = arith.constant 0 : index
    %c0_51 = arith.constant 0 : index
    %140 = vector.load %arg10[%c0_50, %c0_51] : memref<32x96xbf16, #tpu.memory_space<vmem>>, vector<32x96xbf16>
    %c0_52 = arith.constant 0 : index
    %c0_53 = arith.constant 0 : index
    %141 = vector.load %arg11[%c0_52, %c0_53] : memref<32x32xbf16, #tpu.memory_space<vmem>>, vector<32x32xbf16>
    %c0_54 = arith.constant 0 : index
    %c0_55 = arith.constant 0 : index
    %142 = vector.load %arg12[%c0_54, %c0_55] : memref<1x32xf32, #tpu.memory_space<vmem>>, vector<1x32xf32>
    %cst_56 = arith.constant dense<0.000000e+00> : vector<1x8xf32>
    %143 = vector.multi_reduction <add>, %0, %cst_56 [2] : vector<1x8x32xf32> to vector<1x8xf32>
    %144 = vector.shape_cast %143 : vector<1x8xf32> to vector<1x8x1xf32>
    %cst_57 = arith.constant 3.200000e+01 : f32
    %145 = vector.broadcast %cst_57 : f32 to vector<1x8x1xf32>
    %146 = arith.divf %144, %145 : vector<1x8x1xf32>
    %147 = vector.broadcast %146 : vector<1x8x1xf32> to vector<1x8x32xf32>
    %148 = arith.subf %0, %147 : vector<1x8x32xf32>
    %149 = arith.mulf %148, %148 : vector<1x8x32xf32>
    %cst_58 = arith.constant dense<0.000000e+00> : vector<1x8xf32>
    %150 = vector.multi_reduction <add>, %149, %cst_58 [2] : vector<1x8x32xf32> to vector<1x8xf32>
    %151 = vector.shape_cast %150 : vector<1x8xf32> to vector<1x8x1xf32>
    %cst_59 = arith.constant 3.200000e+01 : f32
    %152 = vector.broadcast %cst_59 : f32 to vector<1x8x1xf32>
    %153 = arith.divf %151, %152 : vector<1x8x1xf32>
    %cst_60 = arith.constant 9.99999974E-6 : f32
    %154 = vector.broadcast %cst_60 : f32 to vector<1x8x1xf32>
    %155 = arith.addf %153, %154 : vector<1x8x1xf32>
    %156 = math.rsqrt %155 : vector<1x8x1xf32>
    %157 = vector.broadcast %156 : vector<1x8x1xf32> to vector<1x8x32xf32>
    %158 = arith.mulf %148, %157 : vector<1x8x32xf32>
    %159 = vector.shape_cast %138 : vector<1x32xf32> to vector<1x1x32xf32>
    %160 = vector.broadcast %159 : vector<1x1x32xf32> to vector<1x8x32xf32>
    %161 = arith.mulf %158, %160 : vector<1x8x32xf32>
    %162 = vector.shape_cast %139 : vector<1x32xf32> to vector<1x1x32xf32>
    %163 = vector.broadcast %162 : vector<1x1x32xf32> to vector<1x8x32xf32>
    %164 = arith.addf %161, %163 : vector<1x8x32xf32>
    %165 = vector.shape_cast %164 : vector<1x8x32xf32> to vector<8x32xf32>
    %166 = arith.truncf %165 : vector<8x32xf32> to vector<8x32xbf16>
    %cst_61 = arith.constant dense<0.000000e+00> : vector<8x96xf32>
    %167 = tpu.matmul %166, %140, %cst_61 {dimension_numbers = #tpu.dot_dimension_numbers<[1], [0], [0], [1], [0, 0, 1, 1], [], []>} : vector<8x32xbf16>, vector<32x96xbf16>, vector<8x96xf32> -> vector<8x96xf32>
    %168 = vector.extract_strided_slice %167 {offsets = [0, 0], sizes = [8, 32], strides = [1, 1]} : vector<8x96xf32> to vector<8x32xf32>
    %cst_62 = arith.constant 0.353553385 : f32
    %169 = vector.broadcast %cst_62 : f32 to vector<8x32xf32>
    %170 = arith.mulf %168, %169 : vector<8x32xf32>
    %171 = arith.truncf %170 : vector<8x32xf32> to vector<8x32xbf16>
    %172 = vector.extract_strided_slice %167 {offsets = [0, 32], sizes = [8, 32], strides = [1, 1]} : vector<8x96xf32> to vector<8x32xf32>
    %173 = arith.truncf %172 : vector<8x32xf32> to vector<8x32xbf16>
    %174 = vector.extract_strided_slice %167 {offsets = [0, 64], sizes = [8, 32], strides = [1, 1]} : vector<8x96xf32> to vector<8x32xf32>
    %175 = arith.truncf %174 : vector<8x32xf32> to vector<8x32xbf16>
    %176 = vector.extract_strided_slice %171 {offsets = [0, 0], sizes = [8, 8], strides = [1, 1]} : vector<8x32xbf16> to vector<8x8xbf16>
    %177 = vector.shape_cast %176 : vector<8x8xbf16> to vector<1x8x8xbf16>
    %178 = vector.extract_strided_slice %173 {offsets = [0, 0], sizes = [8, 8], strides = [1, 1]} : vector<8x32xbf16> to vector<8x8xbf16>
    %179 = vector.shape_cast %178 : vector<8x8xbf16> to vector<1x8x8xbf16>
    %180 = vector.extract_strided_slice %175 {offsets = [0, 0], sizes = [8, 8], strides = [1, 1]} : vector<8x32xbf16> to vector<8x8xbf16>
    %181 = vector.shape_cast %180 : vector<8x8xbf16> to vector<1x8x8xbf16>
    "tpu.trace_start"() <{level = 10 : i32, message = "bqd,bkd->bqk"}> : () -> ()
    %cst_63 = arith.constant dense<0.000000e+00> : vector<1x8x8xf32>
    %182 = tpu.matmul %177, %179, %cst_63 {dimension_numbers = #tpu.dot_dimension_numbers<[2], [2], [1], [1], [0, 0, 0, 1, 1, 1], [0], [0]>} : vector<1x8x8xbf16>, vector<1x8x8xbf16>, vector<1x8x8xf32> -> vector<1x8x8xf32>
    "tpu.trace_stop"() : () -> ()
    %cst_64 = arith.constant dense<0xFF800000> : vector<1x8xf32>
    %183 = vector.multi_reduction <maximumf>, %182, %cst_64 [2] : vector<1x8x8xf32> to vector<1x8xf32>
    %184 = vector.shape_cast %183 : vector<1x8xf32> to vector<1x8x1xf32>
    %185 = vector.broadcast %184 : vector<1x8x1xf32> to vector<1x8x8xf32>
    %186 = arith.subf %182, %185 : vector<1x8x8xf32>
    %187 = math.exp %186 : vector<1x8x8xf32>
    %cst_65 = arith.constant dense<0.000000e+00> : vector<1x8xf32>
    %188 = vector.multi_reduction <add>, %187, %cst_65 [2] : vector<1x8x8xf32> to vector<1x8xf32>
    %189 = vector.shape_cast %188 : vector<1x8xf32> to vector<1x8x1xf32>
    %190 = tpu.reciprocal %189 {approx = true} : vector<1x8x1xf32> -> vector<1x8x1xf32>
    %191 = vector.broadcast %190 : vector<1x8x1xf32> to vector<1x8x8xf32>
    %192 = arith.mulf %187, %191 : vector<1x8x8xf32>
    %193 = arith.truncf %192 : vector<1x8x8xf32> to vector<1x8x8xbf16>
    "tpu.trace_start"() <{level = 10 : i32, message = "bqk,bkd->bqd"}> : () -> ()
    %cst_66 = arith.constant dense<0.000000e+00> : vector<1x8x8xf32>
    %194 = tpu.matmul %193, %181, %cst_66 {dimension_numbers = #tpu.dot_dimension_numbers<[2], [1], [1], [2], [0, 0, 0, 1, 1, 2], [0], [0]>} : vector<1x8x8xbf16>, vector<1x8x8xbf16>, vector<1x8x8xf32> -> vector<1x8x8xf32>
    "tpu.trace_stop"() : () -> ()
    %195 = vector.shape_cast %194 : vector<1x8x8xf32> to vector<8x8xf32>
    %196 = arith.truncf %195 : vector<8x8xf32> to vector<8x8xbf16>
    %c0_67 = arith.constant 0 : index
    %c0_68 = arith.constant 0 : index
    %197 = vector.load %arg15[%c0_67, %c0_68] : memref<8x32xbf16, #tpu.memory_space<vmem>>, vector<8x8xbf16>
    tpu.vector_store %arg15[%c0_67, %c0_68], %196 {strides = array<i32>} : memref<8x32xbf16, #tpu.memory_space<vmem>>, vector<8x8xbf16>,
    %198 = vector.extract_strided_slice %171 {offsets = [0, 8], sizes = [8, 8], strides = [1, 1]} : vector<8x32xbf16> to vector<8x8xbf16>
    %199 = vector.shape_cast %198 : vector<8x8xbf16> to vector<1x8x8xbf16>
    %200 = vector.extract_strided_slice %173 {offsets = [0, 8], sizes = [8, 8], strides = [1, 1]} : vector<8x32xbf16> to vector<8x8xbf16>
    %201 = vector.shape_cast %200 : vector<8x8xbf16> to vector<1x8x8xbf16>
    %202 = vector.extract_strided_slice %175 {offsets = [0, 8], sizes = [8, 8], strides = [1, 1]} : vector<8x32xbf16> to vector<8x8xbf16>
    %203 = vector.shape_cast %202 : vector<8x8xbf16> to vector<1x8x8xbf16>
    "tpu.trace_start"() <{level = 10 : i32, message = "bqd,bkd->bqk"}> : () -> ()
    %cst_69 = arith.constant dense<0.000000e+00> : vector<1x8x8xf32>
    %204 = tpu.matmul %199, %201, %cst_69 {dimension_numbers = #tpu.dot_dimension_numbers<[2], [2], [1], [1], [0, 0, 0, 1, 1, 1], [0], [0]>} : vector<1x8x8xbf16>, vector<1x8x8xbf16>, vector<1x8x8xf32> -> vector<1x8x8xf32>
    "tpu.trace_stop"() : () -> ()
    %cst_70 = arith.constant dense<0xFF800000> : vector<1x8xf32>
    %205 = vector.multi_reduction <maximumf>, %204, %cst_70 [2] : vector<1x8x8xf32> to vector<1x8xf32>
    %206 = vector.shape_cast %205 : vector<1x8xf32> to vector<1x8x1xf32>
    %207 = vector.broadcast %206 : vector<1x8x1xf32> to vector<1x8x8xf32>
    %208 = arith.subf %204, %207 : vector<1x8x8xf32>
    %209 = math.exp %208 : vector<1x8x8xf32>
    %cst_71 = arith.constant dense<0.000000e+00> : vector<1x8xf32>
    %210 = vector.multi_reduction <add>, %209, %cst_71 [2] : vector<1x8x8xf32> to vector<1x8xf32>
    %211 = vector.shape_cast %210 : vector<1x8xf32> to vector<1x8x1xf32>
    %212 = tpu.reciprocal %211 {approx = true} : vector<1x8x1xf32> -> vector<1x8x1xf32>
    %213 = vector.broadcast %212 : vector<1x8x1xf32> to vector<1x8x8xf32>
    %214 = arith.mulf %209, %213 : vector<1x8x8xf32>
    %215 = arith.truncf %214 : vector<1x8x8xf32> to vector<1x8x8xbf16>
    "tpu.trace_start"() <{level = 10 : i32, message = "bqk,bkd->bqd"}> : () -> ()
    %cst_72 = arith.constant dense<0.000000e+00> : vector<1x8x8xf32>
    %216 = tpu.matmul %215, %203, %cst_72 {dimension_numbers = #tpu.dot_dimension_numbers<[2], [1], [1], [2], [0, 0, 0, 1, 1, 2], [0], [0]>} : vector<1x8x8xbf16>, vector<1x8x8xbf16>, vector<1x8x8xf32> -> vector<1x8x8xf32>
    "tpu.trace_stop"() : () -> ()
    %217 = vector.shape_cast %216 : vector<1x8x8xf32> to vector<8x8xf32>
    %218 = arith.truncf %217 : vector<8x8xf32> to vector<8x8xbf16>
    %c0_73 = arith.constant 0 : index
    %c8_74 = arith.constant 8 : index
    %219 = vector.load %arg15[%c0_73, %c8_74] : memref<8x32xbf16, #tpu.memory_space<vmem>>, vector<8x8xbf16>
    tpu.vector_store %arg15[%c0_73, %c8_74], %218 {strides = array<i32>} : memref<8x32xbf16, #tpu.memory_space<vmem>>, vector<8x8xbf16>,
    %220 = vector.extract_strided_slice %171 {offsets = [0, 16], sizes = [8, 8], strides = [1, 1]} : vector<8x32xbf16> to vector<8x8xbf16>
    %221 = vector.shape_cast %220 : vector<8x8xbf16> to vector<1x8x8xbf16>
    %222 = vector.extract_strided_slice %173 {offsets = [0, 16], sizes = [8, 8], strides = [1, 1]} : vector<8x32xbf16> to vector<8x8xbf16>
    %223 = vector.shape_cast %222 : vector<8x8xbf16> to vector<1x8x8xbf16>
    %224 = vector.extract_strided_slice %175 {offsets = [0, 16], sizes = [8, 8], strides = [1, 1]} : vector<8x32xbf16> to vector<8x8xbf16>
    %225 = vector.shape_cast %224 : vector<8x8xbf16> to vector<1x8x8xbf16>
    "tpu.trace_start"() <{level = 10 : i32, message = "bqd,bkd->bqk"}> : () -> ()
    %cst_75 = arith.constant dense<0.000000e+00> : vector<1x8x8xf32>
    %226 = tpu.matmul %221, %223, %cst_75 {dimension_numbers = #tpu.dot_dimension_numbers<[2], [2], [1], [1], [0, 0, 0, 1, 1, 1], [0], [0]>} : vector<1x8x8xbf16>, vector<1x8x8xbf16>, vector<1x8x8xf32> -> vector<1x8x8xf32>
    "tpu.trace_stop"() : () -> ()
    %cst_76 = arith.constant dense<0xFF800000> : vector<1x8xf32>
    %227 = vector.multi_reduction <maximumf>, %226, %cst_76 [2] : vector<1x8x8xf32> to vector<1x8xf32>
    %228 = vector.shape_cast %227 : vector<1x8xf32> to vector<1x8x1xf32>
    %229 = vector.broadcast %228 : vector<1x8x1xf32> to vector<1x8x8xf32>
    %230 = arith.subf %226, %229 : vector<1x8x8xf32>
    %231 = math.exp %230 : vector<1x8x8xf32>
    %cst_77 = arith.constant dense<0.000000e+00> : vector<1x8xf32>
    %232 = vector.multi_reduction <add>, %231, %cst_77 [2] : vector<1x8x8xf32> to vector<1x8xf32>
    %233 = vector.shape_cast %232 : vector<1x8xf32> to vector<1x8x1xf32>
    %234 = tpu.reciprocal %233 {approx = true} : vector<1x8x1xf32> -> vector<1x8x1xf32>
    %235 = vector.broadcast %234 : vector<1x8x1xf32> to vector<1x8x8xf32>
    %236 = arith.mulf %231, %235 : vector<1x8x8xf32>
    %237 = arith.truncf %236 : vector<1x8x8xf32> to vector<1x8x8xbf16>
    "tpu.trace_start"() <{level = 10 : i32, message = "bqk,bkd->bqd"}> : () -> ()
    %cst_78 = arith.constant dense<0.000000e+00> : vector<1x8x8xf32>
    %238 = tpu.matmul %237, %225, %cst_78 {dimension_numbers = #tpu.dot_dimension_numbers<[2], [1], [1], [2], [0, 0, 0, 1, 1, 2], [0], [0]>} : vector<1x8x8xbf16>, vector<1x8x8xbf16>, vector<1x8x8xf32> -> vector<1x8x8xf32>
    "tpu.trace_stop"() : () -> ()
    %239 = vector.shape_cast %238 : vector<1x8x8xf32> to vector<8x8xf32>
    %240 = arith.truncf %239 : vector<8x8xf32> to vector<8x8xbf16>
    %c0_79 = arith.constant 0 : index
    %c16_80 = arith.constant 16 : index
    %241 = vector.load %arg15[%c0_79, %c16_80] : memref<8x32xbf16, #tpu.memory_space<vmem>>, vector<8x8xbf16>
    tpu.vector_store %arg15[%c0_79, %c16_80], %240 {strides = array<i32>} : memref<8x32xbf16, #tpu.memory_space<vmem>>, vector<8x8xbf16>,
    %242 = vector.extract_strided_slice %171 {offsets = [0, 24], sizes = [8, 8], strides = [1, 1]} : vector<8x32xbf16> to vector<8x8xbf16>
    %243 = vector.shape_cast %242 : vector<8x8xbf16> to vector<1x8x8xbf16>
    %244 = vector.extract_strided_slice %173 {offsets = [0, 24], sizes = [8, 8], strides = [1, 1]} : vector<8x32xbf16> to vector<8x8xbf16>
    %245 = vector.shape_cast %244 : vector<8x8xbf16> to vector<1x8x8xbf16>
    %246 = vector.extract_strided_slice %175 {offsets = [0, 24], sizes = [8, 8], strides = [1, 1]} : vector<8x32xbf16> to vector<8x8xbf16>
    %247 = vector.shape_cast %246 : vector<8x8xbf16> to vector<1x8x8xbf16>
    "tpu.trace_start"() <{level = 10 : i32, message = "bqd,bkd->bqk"}> : () -> ()
    %cst_81 = arith.constant dense<0.000000e+00> : vector<1x8x8xf32>
    %248 = tpu.matmul %243, %245, %cst_81 {dimension_numbers = #tpu.dot_dimension_numbers<[2], [2], [1], [1], [0, 0, 0, 1, 1, 1], [0], [0]>} : vector<1x8x8xbf16>, vector<1x8x8xbf16>, vector<1x8x8xf32> -> vector<1x8x8xf32>
    "tpu.trace_stop"() : () -> ()
    %cst_82 = arith.constant dense<0xFF800000> : vector<1x8xf32>
    %249 = vector.multi_reduction <maximumf>, %248, %cst_82 [2] : vector<1x8x8xf32> to vector<1x8xf32>
    %250 = vector.shape_cast %249 : vector<1x8xf32> to vector<1x8x1xf32>
    %251 = vector.broadcast %250 : vector<1x8x1xf32> to vector<1x8x8xf32>
    %252 = arith.subf %248, %251 : vector<1x8x8xf32>
    %253 = math.exp %252 : vector<1x8x8xf32>
    %cst_83 = arith.constant dense<0.000000e+00> : vector<1x8xf32>
    %254 = vector.multi_reduction <add>, %253, %cst_83 [2] : vector<1x8x8xf32> to vector<1x8xf32>
    %255 = vector.shape_cast %254 : vector<1x8xf32> to vector<1x8x1xf32>
    %256 = tpu.reciprocal %255 {approx = true} : vector<1x8x1xf32> -> vector<1x8x1xf32>
    %257 = vector.broadcast %256 : vector<1x8x1xf32> to vector<1x8x8xf32>
    %258 = arith.mulf %253, %257 : vector<1x8x8xf32>
    %259 = arith.truncf %258 : vector<1x8x8xf32> to vector<1x8x8xbf16>
    "tpu.trace_start"() <{level = 10 : i32, message = "bqk,bkd->bqd"}> : () -> ()
    %cst_84 = arith.constant dense<0.000000e+00> : vector<1x8x8xf32>
    %260 = tpu.matmul %259, %247, %cst_84 {dimension_numbers = #tpu.dot_dimension_numbers<[2], [1], [1], [2], [0, 0, 0, 1, 1, 2], [0], [0]>} : vector<1x8x8xbf16>, vector<1x8x8xbf16>, vector<1x8x8xf32> -> vector<1x8x8xf32>
    "tpu.trace_stop"() : () -> ()
    %261 = vector.shape_cast %260 : vector<1x8x8xf32> to vector<8x8xf32>
    %262 = arith.truncf %261 : vector<8x8xf32> to vector<8x8xbf16>
    %c0_85 = arith.constant 0 : index
    %c24_86 = arith.constant 24 : index
    %263 = vector.load %arg15[%c0_85, %c24_86] : memref<8x32xbf16, #tpu.memory_space<vmem>>, vector<8x8xbf16>
    tpu.vector_store %arg15[%c0_85, %c24_86], %262 {strides = array<i32>} : memref<8x32xbf16, #tpu.memory_space<vmem>>, vector<8x8xbf16>,
    %c0_87 = arith.constant 0 : index
    %c0_88 = arith.constant 0 : index
    %264 = vector.load %arg15[%c0_87, %c0_88] : memref<8x32xbf16, #tpu.memory_space<vmem>>, vector<8x32xbf16>
    %cst_89 = arith.constant dense<0.000000e+00> : vector<8x32xf32>
    %265 = tpu.matmul %264, %141, %cst_89 {dimension_numbers = #tpu.dot_dimension_numbers<[1], [0], [0], [1], [0, 0, 1, 1], [], []>} : vector<8x32xbf16>, vector<32x32xbf16>, vector<8x32xf32> -> vector<8x32xf32>
    %266 = vector.broadcast %142 : vector<1x32xf32> to vector<8x32xf32>
    %267 = arith.addf %265, %266 : vector<8x32xf32>
    %268 = vector.shape_cast %267 : vector<8x32xf32> to vector<1x8x32xf32>
    %269 = vector.shape_cast %137 : vector<1x32xf32> to vector<1x1x32xf32>
    %270 = vector.broadcast %269 : vector<1x1x32xf32> to vector<1x8x32xf32>
    %271 = arith.mulf %270, %268 : vector<1x8x32xf32>
    %272 = arith.addf %136, %271 : vector<1x8x32xf32>
    %c0_90 = arith.constant 0 : index
    %c0_91 = arith.constant 0 : index
    %c0_92 = arith.constant 0 : index
    %273 = vector.load %arg14[%c0_90, %c0_91, %c0_92] : memref<1x8x32xf32, #tpu.memory_space<vmem>>, vector<1x8x32xf32>
    tpu.vector_store %arg14[%c0_90, %c0_91, %c0_92], %272 {strides = array<i32>} : memref<1x8x32xf32, #tpu.memory_space<vmem>>, vector<1x8x32xf32>,
    return
  }
  func.func @transform_0(%arg0: i32) -> (i32, i32, i32) {
    %c0_i32 = arith.constant 0 : i32
    %c0_i32_0 = arith.constant 0 : i32
    %c0_i32_1 = arith.constant 0 : i32
    return %arg0, %c0_i32, %c0_i32_0 : i32, i32, i32
  }
  func.func @transform_1(%arg0: i32) -> (i32, i32) {
    %c0_i32 = arith.constant 0 : i32
    %c0_i32_0 = arith.constant 0 : i32
    %c0_i32_1 = arith.constant 0 : i32
    return %c0_i32, %c0_i32_0 : i32, i32
  }
  func.func @transform_2(%arg0: i32) -> (i32, i32) {
    %c0_i32 = arith.constant 0 : i32
    %c0_i32_0 = arith.constant 0 : i32
    %c0_i32_1 = arith.constant 0 : i32
    return %c0_i32, %c0_i32_0 : i32, i32
  }
  func.func @transform_3(%arg0: i32) -> (i32, i32) {
    %c0_i32 = arith.constant 0 : i32
    %c0_i32_0 = arith.constant 0 : i32
    %c0_i32_1 = arith.constant 0 : i32
    return %c0_i32, %c0_i32_0 : i32, i32
  }
  func.func @transform_4(%arg0: i32) -> (i32, i32) {
    %c0_i32 = arith.constant 0 : i32
    %c0_i32_0 = arith.constant 0 : i32
    %c0_i32_1 = arith.constant 0 : i32
    return %c0_i32, %c0_i32_0 : i32, i32
  }
  func.func @transform_5(%arg0: i32) -> (i32, i32) {
    %c0_i32 = arith.constant 0 : i32
    %c0_i32_0 = arith.constant 0 : i32
    %c0_i32_1 = arith.constant 0 : i32
    return %c0_i32, %c0_i32_0 : i32, i32
  }
  func.func @transform_6(%arg0: i32) -> (i32, i32) {
    %c0_i32 = arith.constant 0 : i32
    %c0_i32_0 = arith.constant 0 : i32
    %c0_i32_1 = arith.constant 0 : i32
    return %c0_i32, %c0_i32_0 : i32, i32
  }
  func.func @transform_7(%arg0: i32) -> (i32, i32) {
    %c0_i32 = arith.constant 0 : i32
    %c0_i32_0 = arith.constant 0 : i32
    %c0_i32_1 = arith.constant 0 : i32
    return %c0_i32, %c0_i32_0 : i32, i32
  }
  func.func @transform_8(%arg0: i32) -> (i32, i32) {
    %c0_i32 = arith.constant 0 : i32
    %c0_i32_0 = arith.constant 0 : i32
    %c0_i32_1 = arith.constant 0 : i32
    return %c0_i32, %c0_i32_0 : i32, i32
  }
  func.func @transform_9(%arg0: i32) -> (i32, i32) {
    %c0_i32 = arith.constant 0 : i32
    %c0_i32_0 = arith.constant 0 : i32
    %c0_i32_1 = arith.constant 0 : i32
    return %c0_i32, %c0_i32_0 : i32, i32
  }
  func.func @transform_10(%arg0: i32) -> (i32, i32) {
    %c0_i32 = arith.constant 0 : i32
    %c0_i32_0 = arith.constant 0 : i32
    %c0_i32_1 = arith.constant 0 : i32
    return %c0_i32, %c0_i32_0 : i32, i32
  }
  func.func @transform_11(%arg0: i32) -> (i32, i32) {
    %c0_i32 = arith.constant 0 : i32
    %c0_i32_0 = arith.constant 0 : i32
    %c0_i32_1 = arith.constant 0 : i32
    return %c0_i32, %c0_i32_0 : i32, i32
  }
  func.func @transform_12(%arg0: i32) -> (i32, i32) {
    %c0_i32 = arith.constant 0 : i32
    %c0_i32_0 = arith.constant 0 : i32
    %c0_i32_1 = arith.constant 0 : i32
    return %c0_i32, %c0_i32_0 : i32, i32
  }
  func.func @transform_13(%arg0: i32) -> (i32, i32, i32) {
    %c0_i32 = arith.constant 0 : i32
    %c0_i32_0 = arith.constant 0 : i32
    %c0_i32_1 = arith.constant 0 : i32
    return %arg0, %c0_i32, %c0_i32_0 : i32, i32, i32
  }
}

module attributes {stable_mosaic.version = 11 : i64} {
  func.func @_mlp_pair_kernel(%arg0: i32, %arg1: memref<1x8x32xf32, #tpu.memory_space<vmem>>, %arg2: memref<1x32xf32, #tpu.memory_space<vmem>>, %arg3: memref<1x32xf32, #tpu.memory_space<vmem>>, %arg4: memref<32x128xbf16, #tpu.memory_space<vmem>>, %arg5: memref<1x128xf32, #tpu.memory_space<vmem>>, %arg6: memref<128x32xbf16, #tpu.memory_space<vmem>>, %arg7: memref<1x32xf32, #tpu.memory_space<vmem>>, %arg8: memref<1x32xf32, #tpu.memory_space<vmem>>, %arg9: memref<1x32xf32, #tpu.memory_space<vmem>>, %arg10: memref<1x32xf32, #tpu.memory_space<vmem>>, %arg11: memref<32x128xbf16, #tpu.memory_space<vmem>>, %arg12: memref<1x128xf32, #tpu.memory_space<vmem>>, %arg13: memref<128x32xbf16, #tpu.memory_space<vmem>>, %arg14: memref<1x32xf32, #tpu.memory_space<vmem>>, %arg15: memref<1x32xf32, #tpu.memory_space<vmem>>, %arg16: memref<1x8x32xf32, #tpu.memory_space<vmem>>) attributes {dimension_semantics = [#tpu.dimension_semantics<parallel>], iteration_bounds = array<i64: 2>, scalar_prefetch = 0 : i64, scratch_operands = 0 : i64, tpu.core_type = #tpu.core_type<tc>, window_params = [{transform_indices = @transform_0, window_bounds = array<i64: 1, 8, 32>}, {pipeline_mode = #tpu.pipeline_mode<synchronous>, transform_indices = @transform_1, window_bounds = array<i64: 1, 32>}, {pipeline_mode = #tpu.pipeline_mode<synchronous>, transform_indices = @transform_2, window_bounds = array<i64: 1, 32>}, {pipeline_mode = #tpu.pipeline_mode<synchronous>, transform_indices = @transform_3, window_bounds = array<i64: 32, 128>}, {pipeline_mode = #tpu.pipeline_mode<synchronous>, transform_indices = @transform_4, window_bounds = array<i64: 1, 128>}, {pipeline_mode = #tpu.pipeline_mode<synchronous>, transform_indices = @transform_5, window_bounds = array<i64: 128, 32>}, {pipeline_mode = #tpu.pipeline_mode<synchronous>, transform_indices = @transform_6, window_bounds = array<i64: 1, 32>}, {pipeline_mode = #tpu.pipeline_mode<synchronous>, transform_indices = @transform_7, window_bounds = array<i64: 1, 32>}, {pipeline_mode = #tpu.pipeline_mode<synchronous>, transform_indices = @transform_8, window_bounds = array<i64: 1, 32>}, {pipeline_mode = #tpu.pipeline_mode<synchronous>, transform_indices = @transform_9, window_bounds = array<i64: 1, 32>}, {pipeline_mode = #tpu.pipeline_mode<synchronous>, transform_indices = @transform_10, window_bounds = array<i64: 32, 128>}, {pipeline_mode = #tpu.pipeline_mode<synchronous>, transform_indices = @transform_11, window_bounds = array<i64: 1, 128>}, {pipeline_mode = #tpu.pipeline_mode<synchronous>, transform_indices = @transform_12, window_bounds = array<i64: 128, 32>}, {pipeline_mode = #tpu.pipeline_mode<synchronous>, transform_indices = @transform_13, window_bounds = array<i64: 1, 32>}, {pipeline_mode = #tpu.pipeline_mode<synchronous>, transform_indices = @transform_14, window_bounds = array<i64: 1, 32>}, {transform_indices = @transform_15, window_bounds = array<i64: 1, 8, 32>}]} {
    %c0 = arith.constant 0 : index
    %c0_0 = arith.constant 0 : index
    %c0_1 = arith.constant 0 : index
    %0 = vector.load %arg1[%c0, %c0_0, %c0_1] : memref<1x8x32xf32, #tpu.memory_space<vmem>>, vector<1x8x32xf32>
    %c0_2 = arith.constant 0 : index
    %c0_3 = arith.constant 0 : index
    %1 = vector.load %arg8[%c0_2, %c0_3] : memref<1x32xf32, #tpu.memory_space<vmem>>, vector<1x32xf32>
    %c0_4 = arith.constant 0 : index
    %c0_5 = arith.constant 0 : index
    %2 = vector.load %arg2[%c0_4, %c0_5] : memref<1x32xf32, #tpu.memory_space<vmem>>, vector<1x32xf32>
    %c0_6 = arith.constant 0 : index
    %c0_7 = arith.constant 0 : index
    %3 = vector.load %arg3[%c0_6, %c0_7] : memref<1x32xf32, #tpu.memory_space<vmem>>, vector<1x32xf32>
    %c0_8 = arith.constant 0 : index
    %c0_9 = arith.constant 0 : index
    %4 = vector.load %arg4[%c0_8, %c0_9] : memref<32x128xbf16, #tpu.memory_space<vmem>>, vector<32x128xbf16>
    %c0_10 = arith.constant 0 : index
    %c0_11 = arith.constant 0 : index
    %5 = vector.load %arg5[%c0_10, %c0_11] : memref<1x128xf32, #tpu.memory_space<vmem>>, vector<1x128xf32>
    %c0_12 = arith.constant 0 : index
    %c0_13 = arith.constant 0 : index
    %6 = vector.load %arg6[%c0_12, %c0_13] : memref<128x32xbf16, #tpu.memory_space<vmem>>, vector<128x32xbf16>
    %c0_14 = arith.constant 0 : index
    %c0_15 = arith.constant 0 : index
    %7 = vector.load %arg7[%c0_14, %c0_15] : memref<1x32xf32, #tpu.memory_space<vmem>>, vector<1x32xf32>
    %cst = arith.constant dense<0.000000e+00> : vector<1x8xf32>
    %8 = vector.multi_reduction <add>, %0, %cst [2] : vector<1x8x32xf32> to vector<1x8xf32>
    %9 = vector.shape_cast %8 : vector<1x8xf32> to vector<1x8x1xf32>
    %cst_16 = arith.constant 3.200000e+01 : f32
    %10 = vector.broadcast %cst_16 : f32 to vector<1x8x1xf32>
    %11 = arith.divf %9, %10 : vector<1x8x1xf32>
    %12 = vector.broadcast %11 : vector<1x8x1xf32> to vector<1x8x32xf32>
    %13 = arith.subf %0, %12 : vector<1x8x32xf32>
    %14 = arith.mulf %13, %13 : vector<1x8x32xf32>
    %cst_17 = arith.constant dense<0.000000e+00> : vector<1x8xf32>
    %15 = vector.multi_reduction <add>, %14, %cst_17 [2] : vector<1x8x32xf32> to vector<1x8xf32>
    %16 = vector.shape_cast %15 : vector<1x8xf32> to vector<1x8x1xf32>
    %cst_18 = arith.constant 3.200000e+01 : f32
    %17 = vector.broadcast %cst_18 : f32 to vector<1x8x1xf32>
    %18 = arith.divf %16, %17 : vector<1x8x1xf32>
    %cst_19 = arith.constant 9.99999974E-6 : f32
    %19 = vector.broadcast %cst_19 : f32 to vector<1x8x1xf32>
    %20 = arith.addf %18, %19 : vector<1x8x1xf32>
    %21 = math.rsqrt %20 : vector<1x8x1xf32>
    %22 = vector.broadcast %21 : vector<1x8x1xf32> to vector<1x8x32xf32>
    %23 = arith.mulf %13, %22 : vector<1x8x32xf32>
    %24 = vector.shape_cast %2 : vector<1x32xf32> to vector<1x1x32xf32>
    %25 = vector.broadcast %24 : vector<1x1x32xf32> to vector<1x8x32xf32>
    %26 = arith.mulf %23, %25 : vector<1x8x32xf32>
    %27 = vector.shape_cast %3 : vector<1x32xf32> to vector<1x1x32xf32>
    %28 = vector.broadcast %27 : vector<1x1x32xf32> to vector<1x8x32xf32>
    %29 = arith.addf %26, %28 : vector<1x8x32xf32>
    %30 = vector.shape_cast %29 : vector<1x8x32xf32> to vector<8x32xf32>
    %31 = arith.truncf %30 : vector<8x32xf32> to vector<8x32xbf16>
    %cst_20 = arith.constant dense<0.000000e+00> : vector<8x128xf32>
    %32 = tpu.matmul %31, %4, %cst_20 {dimension_numbers = #tpu.dot_dimension_numbers<[1], [0], [0], [1], [0, 0, 1, 1], [], []>} : vector<8x32xbf16>, vector<32x128xbf16>, vector<8x128xf32> -> vector<8x128xf32>
    %33 = vector.broadcast %5 : vector<1x128xf32> to vector<8x128xf32>
    %34 = arith.addf %32, %33 : vector<8x128xf32>
    %cst_21 = arith.constant 5.000000e-01 : f32
    %35 = vector.broadcast %cst_21 : f32 to vector<8x128xf32>
    %36 = arith.mulf %35, %34 : vector<8x128xf32>
    %cst_22 = arith.constant 4.471500e-02 : f32
    %37 = vector.broadcast %cst_22 : f32 to vector<8x128xf32>
    %38 = arith.mulf %37, %34 : vector<8x128xf32>
    %39 = arith.mulf %38, %34 : vector<8x128xf32>
    %40 = arith.mulf %39, %34 : vector<8x128xf32>
    %41 = arith.addf %34, %40 : vector<8x128xf32>
    %cst_23 = arith.constant 0.797884583 : f32
    %42 = vector.broadcast %cst_23 : f32 to vector<8x128xf32>
    %43 = arith.mulf %42, %41 : vector<8x128xf32>
    %44 = math.tanh %43 : vector<8x128xf32>
    %cst_24 = arith.constant 1.000000e+00 : f32
    %45 = vector.broadcast %cst_24 : f32 to vector<8x128xf32>
    %46 = arith.addf %45, %44 : vector<8x128xf32>
    %47 = arith.mulf %36, %46 : vector<8x128xf32>
    %48 = arith.truncf %47 : vector<8x128xf32> to vector<8x128xbf16>
    %cst_25 = arith.constant dense<0.000000e+00> : vector<8x32xf32>
    %49 = tpu.matmul %48, %6, %cst_25 {dimension_numbers = #tpu.dot_dimension_numbers<[1], [0], [0], [1], [0, 0, 1, 1], [], []>} : vector<8x128xbf16>, vector<128x32xbf16>, vector<8x32xf32> -> vector<8x32xf32>
    %50 = vector.broadcast %7 : vector<1x32xf32> to vector<8x32xf32>
    %51 = arith.addf %49, %50 : vector<8x32xf32>
    %52 = vector.shape_cast %51 : vector<8x32xf32> to vector<1x8x32xf32>
    %53 = vector.shape_cast %1 : vector<1x32xf32> to vector<1x1x32xf32>
    %54 = vector.broadcast %53 : vector<1x1x32xf32> to vector<1x8x32xf32>
    %55 = arith.mulf %54, %52 : vector<1x8x32xf32>
    %56 = arith.addf %0, %55 : vector<1x8x32xf32>
    %c0_26 = arith.constant 0 : index
    %c0_27 = arith.constant 0 : index
    %57 = vector.load %arg15[%c0_26, %c0_27] : memref<1x32xf32, #tpu.memory_space<vmem>>, vector<1x32xf32>
    %c0_28 = arith.constant 0 : index
    %c0_29 = arith.constant 0 : index
    %58 = vector.load %arg9[%c0_28, %c0_29] : memref<1x32xf32, #tpu.memory_space<vmem>>, vector<1x32xf32>
    %c0_30 = arith.constant 0 : index
    %c0_31 = arith.constant 0 : index
    %59 = vector.load %arg10[%c0_30, %c0_31] : memref<1x32xf32, #tpu.memory_space<vmem>>, vector<1x32xf32>
    %c0_32 = arith.constant 0 : index
    %c0_33 = arith.constant 0 : index
    %60 = vector.load %arg11[%c0_32, %c0_33] : memref<32x128xbf16, #tpu.memory_space<vmem>>, vector<32x128xbf16>
    %c0_34 = arith.constant 0 : index
    %c0_35 = arith.constant 0 : index
    %61 = vector.load %arg12[%c0_34, %c0_35] : memref<1x128xf32, #tpu.memory_space<vmem>>, vector<1x128xf32>
    %c0_36 = arith.constant 0 : index
    %c0_37 = arith.constant 0 : index
    %62 = vector.load %arg13[%c0_36, %c0_37] : memref<128x32xbf16, #tpu.memory_space<vmem>>, vector<128x32xbf16>
    %c0_38 = arith.constant 0 : index
    %c0_39 = arith.constant 0 : index
    %63 = vector.load %arg14[%c0_38, %c0_39] : memref<1x32xf32, #tpu.memory_space<vmem>>, vector<1x32xf32>
    %cst_40 = arith.constant dense<0.000000e+00> : vector<1x8xf32>
    %64 = vector.multi_reduction <add>, %0, %cst_40 [2] : vector<1x8x32xf32> to vector<1x8xf32>
    %65 = vector.shape_cast %64 : vector<1x8xf32> to vector<1x8x1xf32>
    %cst_41 = arith.constant 3.200000e+01 : f32
    %66 = vector.broadcast %cst_41 : f32 to vector<1x8x1xf32>
    %67 = arith.divf %65, %66 : vector<1x8x1xf32>
    %68 = vector.broadcast %67 : vector<1x8x1xf32> to vector<1x8x32xf32>
    %69 = arith.subf %0, %68 : vector<1x8x32xf32>
    %70 = arith.mulf %69, %69 : vector<1x8x32xf32>
    %cst_42 = arith.constant dense<0.000000e+00> : vector<1x8xf32>
    %71 = vector.multi_reduction <add>, %70, %cst_42 [2] : vector<1x8x32xf32> to vector<1x8xf32>
    %72 = vector.shape_cast %71 : vector<1x8xf32> to vector<1x8x1xf32>
    %cst_43 = arith.constant 3.200000e+01 : f32
    %73 = vector.broadcast %cst_43 : f32 to vector<1x8x1xf32>
    %74 = arith.divf %72, %73 : vector<1x8x1xf32>
    %cst_44 = arith.constant 9.99999974E-6 : f32
    %75 = vector.broadcast %cst_44 : f32 to vector<1x8x1xf32>
    %76 = arith.addf %74, %75 : vector<1x8x1xf32>
    %77 = math.rsqrt %76 : vector<1x8x1xf32>
    %78 = vector.broadcast %77 : vector<1x8x1xf32> to vector<1x8x32xf32>
    %79 = arith.mulf %69, %78 : vector<1x8x32xf32>
    %80 = vector.shape_cast %58 : vector<1x32xf32> to vector<1x1x32xf32>
    %81 = vector.broadcast %80 : vector<1x1x32xf32> to vector<1x8x32xf32>
    %82 = arith.mulf %79, %81 : vector<1x8x32xf32>
    %83 = vector.shape_cast %59 : vector<1x32xf32> to vector<1x1x32xf32>
    %84 = vector.broadcast %83 : vector<1x1x32xf32> to vector<1x8x32xf32>
    %85 = arith.addf %82, %84 : vector<1x8x32xf32>
    %86 = vector.shape_cast %85 : vector<1x8x32xf32> to vector<8x32xf32>
    %87 = arith.truncf %86 : vector<8x32xf32> to vector<8x32xbf16>
    %cst_45 = arith.constant dense<0.000000e+00> : vector<8x128xf32>
    %88 = tpu.matmul %87, %60, %cst_45 {dimension_numbers = #tpu.dot_dimension_numbers<[1], [0], [0], [1], [0, 0, 1, 1], [], []>} : vector<8x32xbf16>, vector<32x128xbf16>, vector<8x128xf32> -> vector<8x128xf32>
    %89 = vector.broadcast %61 : vector<1x128xf32> to vector<8x128xf32>
    %90 = arith.addf %88, %89 : vector<8x128xf32>
    %cst_46 = arith.constant 5.000000e-01 : f32
    %91 = vector.broadcast %cst_46 : f32 to vector<8x128xf32>
    %92 = arith.mulf %91, %90 : vector<8x128xf32>
    %cst_47 = arith.constant 4.471500e-02 : f32
    %93 = vector.broadcast %cst_47 : f32 to vector<8x128xf32>
    %94 = arith.mulf %93, %90 : vector<8x128xf32>
    %95 = arith.mulf %94, %90 : vector<8x128xf32>
    %96 = arith.mulf %95, %90 : vector<8x128xf32>
    %97 = arith.addf %90, %96 : vector<8x128xf32>
    %cst_48 = arith.constant 0.797884583 : f32
    %98 = vector.broadcast %cst_48 : f32 to vector<8x128xf32>
    %99 = arith.mulf %98, %97 : vector<8x128xf32>
    %100 = math.tanh %99 : vector<8x128xf32>
    %cst_49 = arith.constant 1.000000e+00 : f32
    %101 = vector.broadcast %cst_49 : f32 to vector<8x128xf32>
    %102 = arith.addf %101, %100 : vector<8x128xf32>
    %103 = arith.mulf %92, %102 : vector<8x128xf32>
    %104 = arith.truncf %103 : vector<8x128xf32> to vector<8x128xbf16>
    %cst_50 = arith.constant dense<0.000000e+00> : vector<8x32xf32>
    %105 = tpu.matmul %104, %62, %cst_50 {dimension_numbers = #tpu.dot_dimension_numbers<[1], [0], [0], [1], [0, 0, 1, 1], [], []>} : vector<8x128xbf16>, vector<128x32xbf16>, vector<8x32xf32> -> vector<8x32xf32>
    %106 = vector.broadcast %63 : vector<1x32xf32> to vector<8x32xf32>
    %107 = arith.addf %105, %106 : vector<8x32xf32>
    %108 = vector.shape_cast %107 : vector<8x32xf32> to vector<1x8x32xf32>
    %109 = vector.shape_cast %57 : vector<1x32xf32> to vector<1x1x32xf32>
    %110 = vector.broadcast %109 : vector<1x1x32xf32> to vector<1x8x32xf32>
    %111 = arith.mulf %110, %108 : vector<1x8x32xf32>
    %112 = arith.addf %56, %111 : vector<1x8x32xf32>
    %c0_51 = arith.constant 0 : index
    %c0_52 = arith.constant 0 : index
    %c0_53 = arith.constant 0 : index
    %113 = vector.load %arg16[%c0_51, %c0_52, %c0_53] : memref<1x8x32xf32, #tpu.memory_space<vmem>>, vector<1x8x32xf32>
    tpu.vector_store %arg16[%c0_51, %c0_52, %c0_53], %112 {strides = array<i32>} : memref<1x8x32xf32, #tpu.memory_space<vmem>>, vector<1x8x32xf32>,
    return
  }
  func.func @transform_0(%arg0: i32) -> (i32, i32, i32) {
    %c0_i32 = arith.constant 0 : i32
    %c0_i32_0 = arith.constant 0 : i32
    %c0_i32_1 = arith.constant 0 : i32
    return %arg0, %c0_i32, %c0_i32_0 : i32, i32, i32
  }
  func.func @transform_1(%arg0: i32) -> (i32, i32) {
    %c0_i32 = arith.constant 0 : i32
    %c0_i32_0 = arith.constant 0 : i32
    %c0_i32_1 = arith.constant 0 : i32
    return %c0_i32, %c0_i32_0 : i32, i32
  }
  func.func @transform_2(%arg0: i32) -> (i32, i32) {
    %c0_i32 = arith.constant 0 : i32
    %c0_i32_0 = arith.constant 0 : i32
    %c0_i32_1 = arith.constant 0 : i32
    return %c0_i32, %c0_i32_0 : i32, i32
  }
  func.func @transform_3(%arg0: i32) -> (i32, i32) {
    %c0_i32 = arith.constant 0 : i32
    %c0_i32_0 = arith.constant 0 : i32
    %c0_i32_1 = arith.constant 0 : i32
    return %c0_i32, %c0_i32_0 : i32, i32
  }
  func.func @transform_4(%arg0: i32) -> (i32, i32) {
    %c0_i32 = arith.constant 0 : i32
    %c0_i32_0 = arith.constant 0 : i32
    %c0_i32_1 = arith.constant 0 : i32
    return %c0_i32, %c0_i32_0 : i32, i32
  }
  func.func @transform_5(%arg0: i32) -> (i32, i32) {
    %c0_i32 = arith.constant 0 : i32
    %c0_i32_0 = arith.constant 0 : i32
    %c0_i32_1 = arith.constant 0 : i32
    return %c0_i32, %c0_i32_0 : i32, i32
  }
  func.func @transform_6(%arg0: i32) -> (i32, i32) {
    %c0_i32 = arith.constant 0 : i32
    %c0_i32_0 = arith.constant 0 : i32
    %c0_i32_1 = arith.constant 0 : i32
    return %c0_i32, %c0_i32_0 : i32, i32
  }
  func.func @transform_7(%arg0: i32) -> (i32, i32) {
    %c0_i32 = arith.constant 0 : i32
    %c0_i32_0 = arith.constant 0 : i32
    %c0_i32_1 = arith.constant 0 : i32
    return %c0_i32, %c0_i32_0 : i32, i32
  }
  func.func @transform_8(%arg0: i32) -> (i32, i32) {
    %c0_i32 = arith.constant 0 : i32
    %c0_i32_0 = arith.constant 0 : i32
    %c0_i32_1 = arith.constant 0 : i32
    return %c0_i32, %c0_i32_0 : i32, i32
  }
  func.func @transform_9(%arg0: i32) -> (i32, i32) {
    %c0_i32 = arith.constant 0 : i32
    %c0_i32_0 = arith.constant 0 : i32
    %c0_i32_1 = arith.constant 0 : i32
    return %c0_i32, %c0_i32_0 : i32, i32
  }
  func.func @transform_10(%arg0: i32) -> (i32, i32) {
    %c0_i32 = arith.constant 0 : i32
    %c0_i32_0 = arith.constant 0 : i32
    %c0_i32_1 = arith.constant 0 : i32
    return %c0_i32, %c0_i32_0 : i32, i32
  }
  func.func @transform_11(%arg0: i32) -> (i32, i32) {
    %c0_i32 = arith.constant 0 : i32
    %c0_i32_0 = arith.constant 0 : i32
    %c0_i32_1 = arith.constant 0 : i32
    return %c0_i32, %c0_i32_0 : i32, i32
  }
  func.func @transform_12(%arg0: i32) -> (i32, i32) {
    %c0_i32 = arith.constant 0 : i32
    %c0_i32_0 = arith.constant 0 : i32
    %c0_i32_1 = arith.constant 0 : i32
    return %c0_i32, %c0_i32_0 : i32, i32
  }
  func.func @transform_13(%arg0: i32) -> (i32, i32) {
    %c0_i32 = arith.constant 0 : i32
    %c0_i32_0 = arith.constant 0 : i32
    %c0_i32_1 = arith.constant 0 : i32
    return %c0_i32, %c0_i32_0 : i32, i32
  }
  func.func @transform_14(%arg0: i32) -> (i32, i32) {
    %c0_i32 = arith.constant 0 : i32
    %c0_i32_0 = arith.constant 0 : i32
    %c0_i32_1 = arith.constant 0 : i32
    return %c0_i32, %c0_i32_0 : i32, i32
  }
  func.func @transform_15(%arg0: i32) -> (i32, i32, i32) {
    %c0_i32 = arith.constant 0 : i32
    %c0_i32_0 = arith.constant 0 : i32
    %c0_i32_1 = arith.constant 0 : i32
    return %arg0, %c0_i32, %c0_i32_0 : i32, i32, i32
  }
}

</mosaic_0001>

<bundles_post_ra>
// kernel: _lambda_.3
= control target key start
LH: loop header
LB: loop body
LE: loop exit
PB: predicated region body
PF: predicated region fallthrough
CT: control target
= control target key end

     0   :  { %s1625_s0 = inlined_call_operand.vmem [shape: f32[2,8,32], index: 0, kind: input, shape index: {}]   ;;  %s1626_s1 = inlined_call_operand.vmem [shape: f32[1,32], index: 1, kind: input, shape index: {}, may-alias: {1,8}]   ;;  %s1627_s2 = inlined_call_operand.vmem [shape: f32[1,32], index: 2, kind: input, shape index: {}, may-alias: {2,9}]   ;;  %s1628_s3 = inlined_call_operand.vmem [shape: bf16[32,128], index: 3, kind: input, shape index: {}]   ;;  %s1629_s4 = inlined_call_operand.vmem [shape: f32[1,128], index: 4, kind: input, shape index: {}]   ;;  %s1630_s5 = inlined_call_operand.hbm [shape: bf16[128,32], index: 5, kind: input, shape index: {}]   ;;  %s1631_s6 = inlined_call_operand.vmem [shape: f32[1,32], index: 6, kind: input, shape index: {}]   ;;  %s1632_s7 = inlined_call_operand.vmem [shape: f32[1,32], index: 7, kind: input, shape index: {}, may-alias: {7,14}]   ;;  %s1633_s8 = inlined_call_operand.vmem [shape: f32[1,32], index: 8, kind: input, shape index: {}, may-alias: {1,8}]   ;;  %s1634_s9 = inlined_call_operand.vmem [shape: f32[1,32], index: 9, kind: input, shape index: {}, may-alias: {2,9}]   ;;  %s1635_s10 = inlined_call_operand.vmem [shape: bf16[32,128], index: 10, kind: input, shape index: {}]   ;;  %s1636_s11 = inlined_call_operand.vmem [shape: f32[1,128], index: 11, kind: input, shape index: {}]   ;;  %s1637_s12 = inlined_call_operand.vmem [shape: bf16[128,32], index: 12, kind: input, shape index: {}]   ;;  %s1638_s13 = inlined_call_operand.vmem [shape: f32[1,32], index: 13, kind: input, shape index: {}]   ;;  %s1639_s14 = inlined_call_operand.vmem [shape: f32[1,32], index: 14, kind: input, shape index: {}, may-alias: {7,14}]   ;;  %s1640_s15 = inlined_call_operand.hbm [shape: f32[2,8,32], index: 15, kind: output, shape index: {}]  }
   0x1   :  { %1646 = sst [smem:[#allocation13_spill]] %s1625_s0 }
   0x2   :  { %20 = vsyncpa [#allocation3], 0 }
   0x3   :  { %21 = vsyncpa [#allocation4], 0 }
   0x4   :  { %23 = vsyncpa [#allocation4 + $0x1], 0  ;;  %s1416_s18 = smov 0   ;;  %s1418_s19 = smov 0  }
   0x5   :  { %s1420_s20 = smov 0   ;;  %s1422_s21 = smov 0  }
   0x6 LB: > { %1647 = sst [smem:[#allocation8_spill]] %s1316_s18  ;;  %s1437_s22 = sadd.s32 4294967295, %s1328_s21   ;;  %s1328_s21 = sphi %s1422_s21, %s1659_s21   ;;  %s1324_s20 = sphi %s1420_s20, %s1661_s20   ;;  %s1320_s19 = sphi %s1418_s19, %s1663_s19   ;;  %s1316_s18 = sphi %s1416_s18, %s1662_s18  }
   0x7   : > { %1648 = sst [smem:[#allocation9_spill]] %s1324_s20  ;;  %s1034_s23 = sadd.s32 4294967294, %s1328_s21  }
   0x8   : > { %s1441_s24 = sadd.s32 1, %s1328_s21   ;;  %s356_s25 = sadd.s32 1, %s1324_s20 }
   0x9   : > { %1649 = sst [smem:[#allocation10_spill]] %s1441_s24  ;;  %s353_s26 = ssub.s32 %s1328_s21, %s1441_s24 }
   0xa   : > { %p366_p0 = scmp.ne.s32.totalorder %s1324_s20, %s1320_s19  ;;  %p354_p1 = scmp.eq.s32.totalorder %s353_s26, 0 }
   0xb   : > { %p367_p2 = scmp.eq.s32.totalorder %s1437_s22, 1  ;;  %p372_p3 = scmp.ne.s32.totalorder %s1320_s19, %s1316_s18 }
   0xc   : > { %p373_p4 = scmp.eq.s32.totalorder %s1034_s23, 1  ;;  %p1035_p7 = scmp.ge.s32.totalorder %s1328_s21, 1 }
   0xd   : > { %s1452_s27 = scalar_select %p354_p1, %s1324_s20, %s356_s25  }
   0xe   : > { %p1454_p5 = por %p367_p2, %p366_p0  ;;  %p1458_p6 = por %p373_p4, %p372_p3 }
   0xf   : > { %1650 = sst [smem:[#allocation11_spill]] %s1452_s27  ;;  %p380_p8 = scmp.lt.s32.totalorder %s1328_s21, 3 }
  0x10   : > { %s1652_s29 = scalar_select %p1458_p6, 1, 0 }
  0x11   : > { %p1172_p9 = scmp.eq.s32.totalorder %s1437_s22, 0  ;;  %p1465_p10 = pnand %p1035_p7, %p380_p8 }
  0x12   : > { %1653 = sst [smem:[#allocation12_spill]] %s1652_s29  ;;  %s1330_s16 = smov [#allocation2]  }
  0x13   : > { %s404_s17 = sshll.u32 %s1330_s16, 4  ;;  %p1164_p11 = pneg %p1465_p10  ;;  %s405_s17 = int_to_ptr.vmem [resolvable:$true] %s404_s17 }
  0x14   : > { %s1249_s23 = scalar_lea.vmem %s405_s17, 1024  ;;  %p1257_p3 = scmp.lt.s32.totalorder %s405_s17, %s405_s17 }
  0x15   : > { %p1165_p12 = pnand %p1172_p9, %p1164_p11  ;;  %p1250_p0 = scmp.ne.s32.totalorder %s405_s17, %s1249_s23 }
  0x16   : > { %p1258_p4 = scmp.lt.s32.totalorder %s1249_s23, %s1249_s23 }
  0x17   : > { %p1240_p13 = pneg %p1165_p12 }
  0x18   : > { %p1259_p6 = por %p1258_p4, %p1257_p3 }
  0x19   : > { %p1252_p1 = pnand %p1250_p0, %p1240_p13 }
  0x1b   : > { %p1253_p2 = pneg %p1252_p1 }
  0x1d   : > { %p1260_p7 = pnand %p1259_p6, %p1253_p2 }
  0x1f   : > { %1263 = shalt.err (!%p1260_p7)
}
  0x20   : > { %s1331_s25 = smov 64   ;;  %s1332_s26 = smov 4  }
  0x21   : > { %1167 = dma.hbm_to_vmem [thread:$0]  (!%p1165_p12), %s1630_s5, 1024, %s405_s17, [#allocation3], %s1331_s25, %s1331_s25, %s1332_s26  }
  0x22   : > { %454 = sbr.rel (%p1465_p10) target bundleno = 797 (0x31d), region = 80 }
  0x27   : > { %1307 = dma.done.wait (%p1172_p9), [#allocation3], 1024  }
  0x28   : > { %1309 = vsyncadd (%p1172_p9), [#allocation3], 4294966272  ;;  %p501_p8 = scmp.lt.s32.totalorder %s1437_s22, 1  ;;  %s1655_s0 = sld [smem:[#allocation13_spill]]  ;;  %vm532_vm0 = vcmask 261120   ;;  %v1212_v7 = vld [vmem:[%s1628_s3 + $0x8] sm:$0xff]  }
  0x29   : > { %v1213_v8 = vld [vmem:[%s1635_s10 + $0x8] sm:$0xff]   ;;  %v1333_v9 = vmov 0.0   ;;  %v1214_v10 = vld [vmem:[%s1628_s3] sm:$0xff]   ;;  %vm1334_vm1 = vmmov 0   ;;  %v1216_v27 = vld [vmem:[#allocation2 + $0x38] sm:$0xff]   ;;  %s498_s29 = sand.u32 1, %s1320_s19  }
  0x2a   : > { %s502_s16 = scalar_select %p501_p8, %s1437_s22, 1  ;;  %1102 = vmatprep.subr.bf16.mxu1 %v1333_v9  ;;  %1130 = vmatprep.subr.bf16.mxu0 %v1333_v9  ;;  %v1215_v11 = vld [vmem:[%s1635_s10] sm:$0xff]   ;;  %v1217_v28 = vld [vmem:[%s1637_s12 + $0x38] sm:$0xff]   ;;  %v1218_v29 = vld [vmem:[#allocation2 + $0x30] sm:$0xff]  }
  0x2b   : > { %1103 = vmatpush3.bf16.msra.mxu1 %v1212_v7  ;;  %1131 = vmatpush3.bf16.msra.mxu0 %v1213_v8  ;;  %v1042_v16 = vld [vmem:[%s1626_s1] ss:$0 sm:$0xff]  ;;  %v1219_v30 = vld [vmem:[%s1637_s12 + $0x30] sm:$0xff]   ;;  %v1220_v31 = vld [vmem:[#allocation2 + $0x28] sm:$0xff]   ;;  %s1040_s17 = sshll.u32 %s498_s29, 3  ;;  %s1075_s24 = sshll.u32 %s1437_s22, 7 }
  0x2c   : > { %s1041_s23 = sshll.u32 %s502_s16, 3  ;;  %1104 = vmatprep.subr.bf16.mxu1 %v1333_v9  ;;  %1132 = vmatprep.subr.bf16.mxu0 %v1333_v9  ;;  %v1058_v17 = vld [vmem:[%s1633_s8] ss:$0 sm:$0xff]  ;;  %v1221_v32 = vld [vmem:[%s1637_s12 + $0x28] sm:$0xff]   ;;  %v1224_v35 = vld [vmem:[#allocation2 + $0x18] sm:$0xff]   ;;  %s961_s16 = scalar_lea.hbm %s1640_s15, %s1075_s24 }
  0x2d   : > { %1106 = vmatprep.mubr.msk.bf16.mxu1 %vm1334_vm1, %v1333_v9  ;;  %1134 = vmatprep.mubr.msk.bf16.mxu0 %vm1334_vm1, %v1333_v9  ;;  %v1043_v19 = vld [vmem:[%s1627_s2] ss:$0 sm:$0xff]  ;;  %v1225_v36 = vld [vmem:[%s1637_s12 + $0x18] sm:$0xff]   ;;  %v1226_v37 = vld [vmem:[#allocation2 + $0x10] sm:$0xff]   ;;  %s1335_s22 = smov [#allocation5]  }
  0x2e   : > { %s504_s18 = scalar_lea.vmem %s1655_s0, %s1041_s23  ;;  %v1059_v20 = vld [vmem:[%s1634_s9] ss:$0 sm:$0xff]  ;;  %v1227_v38 = vld [vmem:[%s1637_s12 + $0x10] sm:$0xff]   ;;  %v1228_v39 = vld [vmem:[#allocation2 + $0x8] sm:$0xff]   ;;  %s950_s23 = scalar_lea.sflag [#allocation4], %s498_s29 }
  0x2f   : > { %v1487_v0 = vld [vmem:[%s504_s18] sm:$0xff]  ;;  %1105 = vmatpush3.bf16.msra.mxu1 %v1214_v10  ;;  %1133 = vmatpush3.bf16.msra.mxu0 %v1215_v11  ;;  %v1229_v40 = vld [vmem:[%s1637_s12 + $0x8] sm:$0xff]   ;;  %s500_s18 = scalar_lea.vmem [#allocation5], %s1040_s17  ;;  %s1268_s17 = sshll.u32 %s1335_s22, 4  ;;  %s1269_s17 = int_to_ptr.vmem [resolvable:$false] %s1268_s17 }
  0x30   : > { %v533_v1 = vsel %vm532_vm0, %v1487_v0, 0.0  ;;  %1110 = vmatprep.subr.bf16.mxu1 %v1333_v9  ;;  %1138 = vmatprep.subr.bf16.mxu0 %v1333_v9  ;;  %v1222_v33 = vld [vmem:[#allocation2 + $0x20] sm:$0xff]   ;;  %s963_s30 = sshll.u32 %s500_s18, 4  ;;  %s1270_s27 = scalar_lea.vmem %s1269_s17, 256  ;;  %s964_s30 = int_to_ptr.vmem [resolvable:$true] %s963_s30 }
  0x31   : > { %534 = vadd.xlane.f32.xlu0 %v533_v1  ;;  %v1223_v34 = vld [vmem:[%s1637_s12 + $0x20] sm:$0xff]   ;;  %s1264_s20 = scalar_lea.vmem %s964_s30, 128  ;;  %p1271_p11 = scmp.lt.s32.totalorder %s964_s30, %s1269_s17 }
  0x32   : > { %v1230_v41 = vld [vmem:[#allocation2] sm:$0xff]   ;;  %p1265_p6 = scmp.ne.s32.totalorder %s964_s30, %s1264_s20  ;;  %p1272_p12 = scmp.lt.s32.totalorder %s1270_s27, %s1264_s20 }
  0x33   : > { %v1231_v42 = vld [vmem:[%s1637_s12] sm:$0xff]  }
  0x34   : > { %v1044_v43 = vld [vmem:[%s1629_s4] ss:$0 sm:$0xff]  ;;  %p1266_p9 = pnand %p1265_p6, %p1454_p5  ;;  %p1273_p13 = por %p1272_p12, %p1271_p11 }
  0x35   : > { %v1060_v44 = vld [vmem:[%s1636_s11] ss:$0 sm:$0xff] }
  0x36   : > { %p1267_p10 = pneg %p1266_p9 }
  0x38   : > { %p1274_p0 = pnand %p1273_p13, %p1267_p10 }
  0xba   : > { %v535_v2 = vpop.xlane.xlu0 %534 }
  0xbb   : > { %v537_v3 = vmul.f32 0.03125, %v535_v2 }
  0xbd   : > { %v538_v4 = vsub.f32 %v1487_v0, %v537_v3 }
  0xbf   : > { %v539_v5 = vmul.f32 %v538_v4, %v538_v4 }
  0xc1   : > { %v540_v6 = vsel %vm532_vm0, %v539_v5, 0.0 }
  0xc2   : > { %541 = vadd.xlane.f32.xlu0 %v540_v6 }
 0x14b   : > { %v542_v12 = vpop.xlane.xlu0 %541 }
 0x14c   : > { %v543_v13 = vmul.f32 0.03125, %v542_v12  ;;  %v1048_v12 = vld [vmem:[%s1631_s6] ss:$0 sm:$0xff] }
 0x14e   : > { %v544_v14 = vadd.f32 1e-05, %v543_v13  ;;  %v1064_v13 = vld [vmem:[%s1638_s13] ss:$0 sm:$0xff] }
 0x150   : > { %1232 = vrsqrt.f32 %v544_v14  ;;  %v1057_v14 = vld [vmem:[%s1632_s7] ss:$0 sm:$0xff] }
 0x15d   : > { %v1233_v15 = vpop.eup %1232 }
 0x15e   : > { %v546_v18 = vmul.f32 %v1233_v15, %v538_v4 }
 0x160   : > { %v553_v21 = vmul.f32 %v1042_v16, %v546_v18  ;;  %v766_v22 = vmul.f32 %v1058_v17, %v546_v18  ;;  %v1073_v18 = vld [vmem:[%s1639_s14] ss:$0 sm:$0xff] }
 0x162   : > { %v560_v23 = vadd.f32 %v1043_v19, %v553_v21  ;;  %v773_v24 = vadd.f32 %v1059_v20, %v766_v22 }
 0x164   : > { %v561_v25 = vpack.c.bf16 %v560_v23, %v560_v23  ;;  %v774_v26 = vpack.c.bf16 %v773_v24, %v773_v24 }
 0x166   : > { %1107 = vmatmul.mubr.msk.bf16.vlgmr.msra.gmra.mxu1 %vm532_vm0, %v561_v25  ;;  %1135 = vmatmul.mubr.msk.bf16.vlgmr.msra.gmra.mxu0 %vm532_vm0, %v774_v26 }
 0x167   : > { %1126 = vmatprep.mubr.msk.bf16.mxu1 %vm1334_vm1, %v1333_v9  ;;  %1154 = vmatprep.mubr.msk.bf16.mxu0 %vm1334_vm1, %v1333_v9 }
 0x168   : > { %1111 = vmatpush3.bf16.msra.mxu1 %v1216_v27  ;;  %1139 = vmatpush3.bf16.msra.mxu0 %v1217_v28 }
 0x169   : > { %1112 = vmatprep.subr.bf16.mxu1 %v1333_v9  ;;  %1140 = vmatprep.subr.bf16.mxu0 %v1333_v9 }
 0x16c   : > { %1113 = vmatpush3.bf16.msra.mxu1 %v1218_v29  ;;  %1141 = vmatpush3.bf16.msra.mxu0 %v1219_v30 }
 0x16d   : > { %1114 = vmatprep.subr.bf16.mxu1 %v1333_v9  ;;  %1142 = vmatprep.subr.bf16.mxu0 %v1333_v9 }
 0x170   : > { %1115 = vmatpush3.bf16.msra.mxu1 %v1220_v31  ;;  %1143 = vmatpush3.bf16.msra.mxu0 %v1221_v32 }
 0x171   : > { %1116 = vmatprep.subr.bf16.mxu1 %v1333_v9  ;;  %1144 = vmatprep.subr.bf16.mxu0 %v1333_v9 }
 0x174   : > { %1117 = vmatpush3.bf16.msra.mxu1 %v1222_v33  ;;  %1145 = vmatpush3.bf16.msra.mxu0 %v1223_v34 }
 0x175   : > { %1118 = vmatprep.subr.bf16.mxu1 %v1333_v9  ;;  %1146 = vmatprep.subr.bf16.mxu0 %v1333_v9 }
 0x178   : > { %1119 = vmatpush3.bf16.msra.mxu1 %v1224_v35  ;;  %1147 = vmatpush3.bf16.msra.mxu0 %v1225_v36 }
 0x179   : > { %1120 = vmatprep.subr.bf16.mxu1 %v1333_v9  ;;  %1148 = vmatprep.subr.bf16.mxu0 %v1333_v9 }
 0x17c   : > { %1121 = vmatpush3.bf16.msra.mxu1 %v1226_v37  ;;  %1149 = vmatpush3.bf16.msra.mxu0 %v1227_v38 }
 0x17d   : > { %1122 = vmatprep.subr.bf16.mxu1 %v1333_v9  ;;  %1150 = vmatprep.subr.bf16.mxu0 %v1333_v9 }
 0x180   : > { %1123 = vmatpush3.bf16.msra.mxu1 %v1228_v39  ;;  %1151 = vmatpush3.bf16.msra.mxu0 %v1229_v40 }
 0x181   : > { %1124 = vmatprep.subr.bf16.mxu1 %v1333_v9  ;;  %1152 = vmatprep.subr.bf16.mxu0 %v1333_v9 }
 0x184   : > { %1125 = vmatpush3.bf16.msra.mxu1 %v1230_v41  ;;  %1153 = vmatpush3.bf16.msra.mxu0 %v1231_v42 }
 0x226   : > { %v617_v45 = vpop.f32.mrf.mxu1  ;;  %v830_v46 = vpop.f32.mrf.mxu0 }
 0x227   : > { %v618_v47 = vadd.f32 %v1044_v43, %v617_v45  ;;  %v831_v48 = vadd.f32 %v1060_v44, %v830_v46 }
 0x228   : > { %v1108_v49 = vpop.f32.mrf.mxu1  ;;  %v1136_v50 = vpop.f32.mrf.mxu0 }
 0x229   : > { %v624_v51 = vmul.f32 0.044715, %v618_v47  ;;  %v837_v52 = vmul.f32 0.044715, %v831_v48  ;;  %v623_v4 = vmul.f32 0.5, %v618_v47  ;;  %v836_v6 = vmul.f32 0.5, %v831_v48 }
 0x22a   : > { %v620_v53 = vpop.f32.mrf.mxu1  ;;  %v833_v54 = vpop.f32.mrf.mxu0 }
 0x22b   : > { %v625_v55 = vmul.f32 %v624_v51, %v618_v47  ;;  %v838_v56 = vmul.f32 %v837_v52, %v831_v48 }
 0x22c   : > { %v1109_v57 = vpop.f32.mrf.mxu1  ;;  %v1137_v58 = vpop.f32.mrf.mxu0 }
 0x22d   : > { %v626_v59 = vmul.f32 %v625_v55, %v618_v47  ;;  %v839_v60 = vmul.f32 %v838_v56, %v831_v48 }
 0x22f   : > { %v627_v61 = vadd.f32 %v626_v59, %v618_v47  ;;  %v840_v62 = vadd.f32 %v839_v60, %v831_v48 }
 0x231   : > { %v628_v63 = vmul.f32 0.7978846, %v627_v61  ;;  %v841_v1 = vmul.f32 0.7978846, %v840_v62 }
 0x233   : > { %1234 = vtanh.f32 %v628_v63 }
 0x234   : > { %1236 = vtanh.f32 %v841_v1 }
 0x240   : > { %v1235_v2 = vpop.eup %1234 }
 0x241   : > { %v1237_v3 = vpop.eup %1236  ;;  %v630_v5 = vadd.f32 1.0, %v1235_v2 }
 0x242   : > { %v843_v7 = vadd.f32 1.0, %v1237_v3 }
 0x243   : > { %v631_v8 = vmul.f32 %v630_v5, %v623_v4 }
 0x244   : > { %v844_v9 = vmul.f32 %v843_v7, %v836_v6 }
 0x245   : > { %v632_v10 = vpack.c.bf16 %v631_v8, %v631_v8 }
 0x246   : > { %v845_v11 = vpack.c.bf16 %v844_v9, %v844_v9 }
 0x247   : > { %1127 = vmatmul.mubr.bf16.vlgmr.msra.gmra.mxu1 %v632_v10 }
 0x248   : > { %1155 = vmatmul.mubr.bf16.vlgmr.msra.gmra.mxu0 %v845_v11 }
 0x307   : > { %v721_v15 = vpop.f32.mrf.mxu1 }
 0x308   : > { %v722_v16 = vadd.f32 %v1048_v12, %v721_v15  ;;  %v934_v17 = vpop.f32.mrf.mxu0 }
 0x309   : > { %v935_v19 = vadd.f32 %v1064_v13, %v934_v17  ;;  %v1128_v20 = vpop.f32.mrf.mxu1 }
 0x30a   : > { %v733_v21 = vmul.f32 %v1057_v14, %v722_v16  ;;  %v1156_v22 = vpop.f32.mrf.mxu0 }
 0x30b   : > { %v724_v23 = vpop.f32.mrf.mxu1  ;;  %v946_v25 = vmul.f32 %v1073_v18, %v935_v19 }
 0x30c   : > { %v734_v24 = vadd.f32 %v733_v21, %v1487_v0  ;;  %v937_v26 = vpop.f32.mrf.mxu0 }
 0x30d   : > { %v1129_v27 = vpop.f32.mrf.mxu1 }
 0x30e   : > { %v947_v28 = vadd.f32 %v946_v25, %v734_v24  ;;  %v1157_v29 = vpop.f32.mrf.mxu0 }
 0x310   : > { %948 = vst.msk [vmem:[%s500_s18] sm:$0xff] %vm532_vm0, %v947_v28 }
 0x311   : > { %1277 = shalt.err (!%p1274_p0)
}
 0x312   : > { %s1278_s25 = scalar_lea.hbm %s961_s16, 128  ;;  %s1282_s18 = scalar_lea.hbm %s1640_s15, 256 }
 0x313   : > { %p1279_p1 = scmp.ne.s32.totalorder %s961_s16, %s1278_s25  ;;  %p1283_p4 = scmp.lt.s32.totalorder %s961_s16, %s1640_s15 }
 0x314   : > { %p1284_p7 = scmp.lt.s32.totalorder %s1282_s18, %s1278_s25 }
 0x315   : > { %p1280_p2 = pnand %p1279_p1, %p1454_p5 }
 0x316   : > { %p1285_p8 = por %p1284_p7, %p1283_p4 }
 0x317   : > { %p1281_p3 = pneg %p1280_p2 }
 0x319   : > { %p1286_p6 = pnand %p1285_p8, %p1281_p3 }
 0x31b   : > { %1289 = shalt.err (!%p1286_p6)
}
 0x31c   : > { %1162 = dma.vmem_to_hbm [thread:$0]  (%p1454_p5), %s964_s30, 128, %s961_s16, %s950_s23  }
 0x31d PF: > { %s1656_s20 = sld [smem:[#allocation8_spill]]  ;;  %p1174_p9 = scmp.ge.s32.totalorder %s1328_s21, 2 }
 0x31e   : > { %s1657_s22 = sld [smem:[#allocation12_spill]] }
 0x323   : > { %s975_s17 = sand.u32 1, %s1656_s20  }
 0x324   : > { %p1658_p10 = scmp.ne.s32.totalorder %s1657_s22, 0  ;;  %s976_s27 = scalar_lea.sflag [#allocation4], %s975_s17 }
 0x326   : > { %p1169_p11 = pnand %p1174_p9, %p1658_p10 }
 0x328   : > { %p1170_p12 = pneg %p1169_p11 }
 0x32a   : > { %1311 = dma.done.wait (%p1170_p12), %s976_s27, 128  }
 0x32b   : > { %1313 = vsyncadd (%p1170_p12), %s976_s27, 4294967168  ;;  %s1659_s21 = sld [smem:[#allocation10_spill]]  ;;  %s1662_s18 = smov %s1320_s19 }
 0x32c   : > { %s1660_s0 = sld [smem:[#allocation9_spill]] }
 0x32d   : > { %s1661_s20 = sld [smem:[#allocation11_spill]] }
 0x331   : > { %p26_p13 = scmp.ge.s32.totalorder %s1659_s21, 4  }
 0x332   : > { %s1663_s19 = smov %s1660_s0 }
 0x333   :  { %28 = sbr.rel (!%p26_p13) target bundleno = 6 (0x6), region = 120 }
 0x338   :  { %981 = vsyncpa [#allocation3], 1 }
 0x339   :  { %983 = vsyncpa [#allocation3 + $0x1], 1 }
 0x33a   :  { %984 = vsyncpa [#allocation4], 1 }
 0x33b   :  { %986 = vsyncpa [#allocation4 + $0x1], 1 }

// kernel: _lambda_.2
= control target key start
LH: loop header
LB: loop body
LE: loop exit
PB: predicated region body
PF: predicated region fallthrough
CT: control target
= control target key end

     0   :  { %s2826_s0 = inlined_call_operand.hbm [shape: f32[2,8,32], index: 0, kind: input, shape index: {}]   ;;  %s2827_s1 = inlined_call_operand.vmem [shape: f32[1,32], index: 1, kind: input, shape index: {}, may-alias: {1,7}]   ;;  %s2828_s2 = inlined_call_operand.vmem [shape: f32[1,32], index: 2, kind: input, shape index: {}, may-alias: {2,8}]   ;;  %s2829_s3 = inlined_call_operand.hbm [shape: bf16[32,96], index: 3, kind: input, shape index: {}]   ;;  %s2830_s4 = inlined_call_operand.hbm [shape: bf16[32,32], index: 4, kind: input, shape index: {}]   ;;  %s2831_s5 = inlined_call_operand.hbm [shape: f32[1,32], index: 5, kind: input, shape index: {}]   ;;  %s2832_s6 = inlined_call_operand.vmem [shape: f32[1,32], index: 6, kind: input, shape index: {}, may-alias: {6,12}]   ;;  %s2833_s7 = inlined_call_operand.vmem [shape: f32[1,32], index: 7, kind: input, shape index: {}, may-alias: {1,7}]   ;;  %s2834_s8 = inlined_call_operand.vmem [shape: f32[1,32], index: 8, kind: input, shape index: {}, may-alias: {2,8}]   ;;  %s2835_s9 = inlined_call_operand.vmem [shape: bf16[32,96], index: 9, kind: input, shape index: {}]   ;;  %s2836_s10 = inlined_call_operand.vmem [shape: bf16[32,32], index: 10, kind: input, shape index: {}]   ;;  %s2837_s11 = inlined_call_operand.vmem [shape: f32[1,32], index: 11, kind: input, shape index: {}]   ;;  %s2838_s12 = inlined_call_operand.vmem [shape: f32[1,32], index: 12, kind: input, shape index: {}, may-alias: {6,12}]   ;;  %s2839_s13 = inlined_call_operand.vmem [shape: f32[2,8,32], index: 13, kind: output, shape index: {}]  }
   0x1   :  { %2846 = sst [smem:[#allocation14_spill]] %s2829_s3 }
   0x2   :  { %2847 = sst [smem:[#allocation15_spill]] %s2830_s4 }
   0x3   :  { %2848 = sst [smem:[#allocation16_spill]] %s2831_s5 }
   0x4   :  { %18 = vsyncpa [#allocation4], 0 }
   0x5   :  { %20 = vsyncpa [#allocation4 + $0x1], 0 }
   0x6   :  { %21 = vsyncpa [#allocation6], 0 }
   0x7   :  { %22 = vsyncpa [#allocation9], 0  ;;  %s2466_s25 = smov 0   ;;  %s2468_s26 = smov 0  }
   0x8   :  { %s2470_s27 = smov 0   ;;  %s2472_s28 = smov 0  }
   0x9 LB: > { %s2485_s29 = sadd.s32 4294967295, %s2372_s28   ;;  %p48_p0 = scmp.ne.s32.totalorder %s2364_s26, %s2360_s25  ;;  %s2372_s28 = sphi %s2472_s28, %s2870_s28   ;;  %s2368_s27 = sphi %s2470_s27, %s2869_s27   ;;  %s2364_s26 = sphi %s2468_s26, %s2868_s26   ;;  %s2360_s25 = sphi %s2466_s25, %s2867_s25  }
   0xa   : > { %p2840_p1 = scmp.eq.s32.totalorder %s2485_s29, 0  ;;  %p1859_p2 = scmp.ge.s32.totalorder %s2372_s28, 1 }
   0xb   : > { %p337_p3 = scmp.lt.s32.totalorder %s2372_s28, 3  ;;  %s2374_s15 = smov [#allocation5]  }
   0xc   : > { %p2493_p4 = por %p2840_p1, %p48_p0  ;;  %s355_s16 = sshll.u32 %s2374_s15, 4  ;;  %s356_s16 = int_to_ptr.vmem [resolvable:$true] %s355_s16 }
   0xd   : > { %p2497_p5 = pnand %p1859_p2, %p337_p3  ;;  %s2375_s18 = smov [#allocation7]  }
   0xe   : > { %s2849_s30 = scalar_select %p2493_p4, 1, 0 }
   0xf   : > { %s2850_s14 = scalar_select %p2497_p5, 1, 0 }
  0x10   : > { %p2108_p6 = pneg %p2497_p5  ;;  %s368_s19 = sshll.u32 %s2375_s18, 4  ;;  %s369_s19 = int_to_ptr.vmem [resolvable:$true] %s368_s19 }
  0x11   : > { %s2376_s20 = smov [#allocation8]   ;;  %s2235_s22 = scalar_lea.vmem %s356_s16, 256 }
  0x12   : > { %p2505_p7 = pnand %p2108_p6, %p2840_p1  ;;  %s382_s21 = sshll.u32 %s2376_s20, 4  ;;  %s383_s21 = int_to_ptr.vmem [resolvable:$true] %s382_s21 }
  0x13   : > { %p2236_p9 = scmp.ne.s32.totalorder %s356_s16, %s2235_s22  ;;  %p2243_p12 = scmp.lt.s32.totalorder %s356_s16, %s356_s16 }
  0x14   : > { %p2226_p8 = pneg %p2505_p7  ;;  %p2244_p13 = scmp.lt.s32.totalorder %s2235_s22, %s2235_s22 }
  0x16   : > { %p2238_p10 = pnand %p2236_p9, %p2226_p8  ;;  %p2245_p0 = por %p2244_p13, %p2243_p12 }
  0x18   : > { %p2239_p11 = pneg %p2238_p10 }
  0x1a   : > { %p2246_p2 = pnand %p2245_p0, %p2239_p11 }
  0x1c   : > { %2249 = shalt.err (!%p2246_p2)
}
  0x1d   : > { %s2377_s23 = smov 64   ;;  %s2378_s24 = smov 4  }
  0x1e   : > { %s2852_s3 = sld [smem:[#allocation14_spill]]  ;;  %s2261_s18 = scalar_lea.vmem %s369_s19, 256 }
  0x1f   : > { %p2262_p3 = scmp.ne.s32.totalorder %s369_s19, %s2261_s18  ;;  %p2269_p10 = scmp.lt.s32.totalorder %s369_s19, %s369_s19 }
  0x20   : > { %p2270_p1 = scmp.lt.s32.totalorder %s2261_s18, %s2261_s18 }
  0x21   : > { %p2264_p6 = pnand %p2262_p3, %p2226_p8 }
  0x22   : > { %p2271_p12 = por %p2270_p1, %p2269_p10 }
  0x23   : > { %p2265_p9 = pneg %p2264_p6 }
  0x24   : > { %2111 = dma.hbm_to_vmem [thread:$0]  (!%p2505_p7), %s2852_s3, 256, %s356_s16, [#allocation6], %s2377_s23, %s2377_s23, %s2378_s24  }
  0x25   : > { %p2272_p11 = pnand %p2271_p12, %p2265_p9 }
  0x27   : > { %2275 = shalt.err (!%p2272_p11)
}
  0x28   : > { %s2853_s4 = sld [smem:[#allocation15_spill]]  ;;  %s2287_s16 = scalar_lea.vmem %s383_s21, 16 }
  0x29   : > { %p2288_p13 = scmp.ne.s32.totalorder %s383_s21, %s2287_s16  ;;  %s2294_s25 = scalar_lea.vmem %s383_s21, 32 }
  0x2a   : > { %p2295_p3 = scmp.lt.s32.totalorder %s383_s21, %s383_s21  ;;  %p2296_p6 = scmp.lt.s32.totalorder %s2294_s25, %s2287_s16 }
  0x2b   : > { %p2290_p0 = pnand %p2288_p13, %p2226_p8 }
  0x2c   : > { %p2297_p1 = por %p2296_p6, %p2295_p3 }
  0x2d   : > { %p2291_p2 = pneg %p2290_p0 }
  0x2e   : > { %2114 = dma.hbm_to_vmem [thread:$0]  (!%p2505_p7), %s2853_s4, 256, %s369_s19, [#allocation6], %s2377_s23, %s2377_s23, %s2378_s24  }
  0x2f   : > { %p2298_p9 = pnand %p2297_p1, %p2291_p2 }
  0x31   : > { %2301 = shalt.err (!%p2298_p9)
}
  0x32   : > { %s2854_s5 = sld [smem:[#allocation16_spill]]  ;;  %s2536_s19 = sadd.s32 1, %s2372_s28  }
  0x33   : > { %s32_s23 = ssub.s32 %s2372_s28, %s2536_s19  ;;  %s35_s24 = sadd.s32 1, %s2368_s27 }
  0x34   : > { %p33_p8 = scmp.eq.s32.totalorder %s32_s23, 0  ;;  %p42_p10 = scmp.ne.s32.totalorder %s2368_s27, %s2364_s26 }
  0x35   : > { %p43_p12 = scmp.eq.s32.totalorder %s2372_s28, 0  ;;  %p2125_p11 = scmp.lt.s32.totalorder %s2372_s28, 2 }
  0x36   : > { %s2546_s17 = scalar_select %p33_p8, %s2368_s27, %s35_s24  }
  0x37   : > { %p44_p13 = por %p43_p12, %p42_p10  ;;  %s414_s20 = sand.u32 1, %s2368_s27  }
  0x38   : > { %2117 = dma.hbm_to_vmem [thread:$0]  (!%p2505_p7), %s2854_s5, 16, %s383_s21, [#allocation9]  }
  0x39   : > { %2855 = sst [smem:[#allocation13_spill]] %s2546_s17  ;;  %s1864_s22 = sshll.u32 %s414_s20, 3 }
  0x3a   : > { %s1865_s16 = sshll.u32 %s2372_s28, 7  ;;  %s418_s21 = scalar_lea.vmem [#allocation3], %s1864_s22 }
  0x3b   : > { %s2553_s18 = scalar_lea.hbm %s2826_s0, %s1865_s16  ;;  %s425_s3 = sshll.u32 %s418_s21, 4  ;;  %s426_s3 = int_to_ptr.vmem [resolvable:$true] %s425_s3 }
  0x3c   : > { %p2555_p7 = pnand %p2125_p11, %p44_p13  ;;  %s415_s24 = scalar_lea.sflag [#allocation4], %s414_s20 }
  0x3d   : > { %s2302_s4 = scalar_lea.hbm %s2553_s18, 128  ;;  %s2307_s25 = scalar_lea.hbm %s2826_s0, 256 }
  0x3e   : > { %p2303_p0 = scmp.ne.s32.totalorder %s2553_s18, %s2302_s4  ;;  %p2304_p2 = pneg %p2555_p7 }
  0x3f   : > { %p2308_p1 = scmp.lt.s32.totalorder %s2553_s18, %s2826_s0  ;;  %p2309_p9 = scmp.lt.s32.totalorder %s2307_s25, %s2302_s4 }
  0x40   : > { %p2305_p3 = pnand %p2304_p2, %p2303_p0 }
  0x41   : > { %p2310_p8 = por %p2309_p9, %p2308_p1 }
  0x42   : > { %p2306_p6 = pneg %p2305_p3 }
  0x44   : > { %p2311_p10 = pnand %p2310_p8, %p2306_p6 }
  0x46   : > { %2314 = shalt.err (!%p2311_p10)
}
  0x47   : > { %s2315_s21 = scalar_lea.vmem %s426_s3, 128  ;;  %s2379_s20 = smov [#allocation3]  }
  0x48   : > { %p2316_p12 = scmp.ne.s32.totalorder %s426_s3, %s2315_s21  ;;  %s2320_s5 = sshll.u32 %s2379_s20, 4  ;;  %s2321_s5 = int_to_ptr.vmem [resolvable:$false] %s2320_s5 }
  0x49   : > { %s2322_s17 = scalar_lea.vmem %s2321_s5, 256  ;;  %p2323_p0 = scmp.lt.s32.totalorder %s426_s3, %s2321_s5 }
  0x4a   : > { %p2318_p11 = pnand %p2316_p12, %p2304_p2  ;;  %p2324_p3 = scmp.lt.s32.totalorder %s2322_s17, %s2315_s21 }
  0x4c   : > { %p2319_p13 = pneg %p2318_p11  ;;  %p2325_p4 = por %p2324_p3, %p2323_p0 }
  0x4e   : > { %p2326_p5 = pnand %p2325_p4, %p2319_p13 }
  0x50   : > { %2329 = shalt.err (!%p2326_p5)
}
  0x51   : > { %2121 = dma.hbm_to_vmem [thread:$0]  (!%p2555_p7), %s2553_s18, 128, %s426_s3, %s415_s24  }
  0x52   : > { %p2857_p6 = scmp.ne.s32.totalorder %s2850_s14, 0 }
  0x53   : > { %s436_s4 = sand.u32 (!%p2857_p6), 1, %s2364_s26   ;;  %p2858_p2 = scmp.ne.s32.totalorder (!%p2857_p6), %s2849_s30, 0 }
  0x54   : > { %434 = sbr.rel (%p2857_p6) target bundleno = 2705 (0xa91), region = 72  ;;  %s1867_s28 = sshll.u32 (!%p2857_p6), %s436_s4, 3 }
  0x55   : > { %s437_s16 = scalar_lea.sflag (!%p2857_p6), [#allocation4], %s436_s4  ;;  %s440_s25 = scalar_lea.vmem (!%p2857_p6), [#allocation3], %s1867_s28 }
  0x59   : > { %2347 = dma.done.wait (%p2858_p2), %s437_s16, 128  }
  0x5a   : > { %2349 = vsyncadd (%p2858_p2), %s437_s16, 4294967168  ;;  %p2859_p4 = scmp.eq.s32.totalorder %s2485_s29, 0 }
  0x5c   : > { %2351 = dma.done.wait (%p2859_p4), [#allocation6], 512   ;;  %p2860_p5 = pmov %p2859_p4 }
  0x5d   : > { %p2861_p7 = pmov %p2859_p4 }
  0x5e   : > { %2353 = vsyncadd (%p2860_p5), [#allocation6], 4294966784 }
  0x5f   : > { %2355 = dma.done.wait (%p2861_p7), [#allocation9], 16   ;;  %p2862_p1 = pmov %p2859_p4 }
  0x60   : > { %vm512_vm0 = vcmask 261120   ;;  %v2588_v0 = vld [vmem:[%s440_s25] sm:$0xff]  ;;  %v2182_v7 = vld [vmem:[#allocation5 + $0x8] sm:$0xff]   ;;  %v2380_v8 = vmov 0.0   ;;  %vm2381_vm1 = vmmov 0   ;;  %v2183_v9 = vld [vmem:[#allocation5] sm:$0xff]  }
  0x61   : > { %2357 = vsyncadd (%p2862_p1), [#allocation9], 4294967280  ;;  %v513_v1 = vsel %vm512_vm0, %v2588_v0, 0.0  ;;  %1966 = vmatprep.subr.bf16.mxu0 %v2380_v8  ;;  %1970 = vmatprep.mubr.msk.bf16.mxu0 %vm2381_vm1, %v2380_v8  ;;  %v1872_v14 = vld [vmem:[%s2827_s1] ss:$0 sm:$0xff]  ;;  %s2382_s17 = smov 96  }
  0x62   : > { %514 = vadd.xlane.f32.xlu0 %v513_v1  ;;  %1967 = vmatpush3.bf16.msra.mxu0 %v2182_v7  ;;  %v1873_v16 = vld [vmem:[%s2828_s2] ss:$0 sm:$0xff]  ;;  %s2383_s18 = smov 120   ;;  %s2384_s23 = smov 88   ;;  %vm603_vm2 = vcmask 64512   ;;  %vm667_vm3 = vcmask 1043456  }
  0x63   : > { %1974 = vmatprep.subr.bf16.mxu1 %v2380_v8  ;;  %1968 = vmatprep.subr.bf16.mxu0 %v2380_v8  ;;  %s2385_s24 = smov 80   ;;  %s2386_s15 = smov 112   ;;  %vm712_vm4 = vcmask 60416   ;;  %vm832_vm5 = vcmask 126016   ;;  %vm951_vm6 = vcmask 191616   ;;  %vm1070_vm7 = vcmask 257216  }
  0x64   : > { %1976 = vmatprep.mubr.msk.bf16.mxu1 %vm2381_vm1, %v2380_v8  ;;  %s2387_s22 = smov 72   ;;  %s2388_s21 = smov 104  }
  0x65   : > { %s2389_s20 = smov 64   ;;  %s2845_s4 = smov 56  }
  0x66   : > { %1969 = vmatpush3.bf16.msra.mxu0 %v2183_v9  ;;  %s2844_s28 = smov 48   ;;  %s2843_s16 = smov 40  }
  0x67   : > { %1980 = vmatprep.subr.bf16.mxu0 %v2380_v8  ;;  %p494_p9 = scmp.lt.s32.totalorder %s2485_s29, 1 }
  0x69   : > { %s2872_s29 = smov (!%p494_p9, %s2485_s29), 1 }
  0xeb   : > { %v515_v2 = vpop.xlane.xlu0 %514 }
  0xec   : > { %v517_v3 = vmul.f32 0.03125, %v515_v2 }
  0xee   : > { %v518_v4 = vsub.f32 %v2588_v0, %v517_v3 }
  0xf0   : > { %v519_v5 = vmul.f32 %v518_v4, %v518_v4 }
  0xf2   : > { %v520_v6 = vsel %vm512_vm0, %v519_v5, 0.0 }
  0xf3   : > { %521 = vadd.xlane.f32.xlu0 %v520_v6 }
 0x17c   : > { %v522_v10 = vpop.xlane.xlu0 %521 }
 0x17d   : > { %v523_v11 = vmul.f32 0.03125, %v522_v10 }
 0x17f   : > { %v524_v12 = vadd.f32 1e-05, %v523_v11 }
 0x181   : > { %2190 = vrsqrt.f32 %v524_v12 }
 0x18e   : > { %v2191_v13 = vpop.eup %2190 }
 0x18f   : > { %v2605_v15 = vmul.f32 %v2191_v13, %v518_v4 }
 0x191   : > { %v533_v17 = vmul.f32 %v1872_v14, %v2605_v15 }
 0x193   : > { %v540_v18 = vadd.f32 %v1873_v16, %v533_v17 }
 0x195   : > { %v541_v19 = vpack.c.bf16 %v540_v18, %v540_v18 }
 0x197   : > { %1971 = vmatmul.mubr.msk.bf16.vlgmr.msra.gmra.mxu0 %vm512_vm0, %v541_v19 }
 0x198   : > { %1982 = vmatprep.mubr.msk.bf16.mxu0 %vm2381_vm1, %v2380_v8 }
 0x257   : > { %v591_v20 = vpop.f32.mrf.mxu0 }
 0x258   : > { %v597_v21 = vmul.f32 0.35355338, %v591_v20  ;;  %v2614_v22 = vpack.c.bf16 %v591_v20, %v591_v20 }
 0x259   : > { %v1972_v23 = vpop.f32.mrf.mxu0 }
 0x25a   : > { %v598_v24 = vpack.c.bf16 %v597_v21, %v597_v21  ;;  %601 = vrot.lane.b32.xlu1 %v2614_v22, %s2382_s17 }
 0x25b   : > { %v594_v25 = vpop.f32.mrf.mxu0 }
 0x25c   : > { %715 = vrot.lane.b32.xlu0 %v598_v24, %s2383_s18 }
 0x25d   : > { %v1973_v26 = vpop.f32.mrf.mxu0 }
 0x25e   : > { %717 = vrot.lane.b32.xlu1 %v2614_v22, %s2384_s23 }
 0x262   : > { %836 = vrot.lane.b32.xlu1 %v2614_v22, %s2385_s24 }
 0x266   : > { %834 = vrot.lane.b32.xlu1 %v598_v24, %s2386_s15 }
 0x26a   : > { %955 = vrot.lane.b32.xlu1 %v2614_v22, %s2387_s22 }
 0x26e   : > { %953 = vrot.lane.b32.xlu1 %v598_v24, %s2388_s21 }
 0x2cc   : > { %v602_v27 = vpop.permute.xlu1 %601 }
 0x2cd   : > { %v608_v28 = vsel %vm603_vm2, %v602_v27, 0 }
 0x2ce   : > { %1975 = vmatpush3.bf16.xpose.msra.mxu1 %v608_v28  ;;  %v716_v32 = vpop.permute.xlu0 %715 }
 0x2cf   : > { %1986 = vmatprep.subr.bf16.mxu1 %v2380_v8 }
 0x2d0   : > { %v718_v29 = vpop.permute.xlu1 %717 }
 0x2d1   : > { %v723_v30 = vsel %vm603_vm2, %v718_v29, 0 }
 0x2d4   : > { %v837_v31 = vpop.permute.xlu1 %836 }
 0x2d5   : > { %1977 = vmatmul.mubr.msk.bf16.vlgmr.msra.gmra.mxu1 %vm603_vm2, %v598_v24  ;;  %v842_v34 = vsel %vm603_vm2, %v837_v31, 0 }
 0x2d6   : > { %1987 = vmatpush3.bf16.xpose.msra.mxu1 %v723_v30  ;;  %1988 = vmatprep.mubr.msk.bf16.mxu1 %vm2381_vm1, %v2380_v8 }
 0x2d7   : > { %1998 = vmatprep.subr.bf16.mxu1 %v2380_v8 }
 0x2d8   : > { %v835_v33 = vpop.permute.xlu1 %834 }
 0x2dc   : > { %v956_v35 = vpop.permute.xlu1 %955 }
 0x2dd   : > { %1989 = vmatmul.mubr.msk.bf16.vlgmr.msra.gmra.mxu1 %vm603_vm2, %v716_v32  ;;  %v961_v36 = vsel %vm603_vm2, %v956_v35, 0 }
 0x2de   : > { %1999 = vmatpush3.bf16.xpose.msra.mxu1 %v842_v34  ;;  %2000 = vmatprep.mubr.msk.bf16.mxu1 %vm2381_vm1, %v2380_v8 }
 0x2df   : > { %2010 = vmatprep.subr.bf16.mxu1 %v2380_v8 }
 0x2e0   : > { %v954_v37 = vpop.permute.xlu1 %953 }
 0x2e5   : > { %2001 = vmatmul.mubr.msk.bf16.vlgmr.msra.gmra.mxu1 %vm603_vm2, %v835_v33 }
 0x2e6   : > { %2011 = vmatpush3.bf16.xpose.msra.mxu1 %v961_v36  ;;  %2012 = vmatprep.mubr.msk.bf16.mxu1 %vm2381_vm1, %v2380_v8 }
 0x2e7   : > { %2022 = vmatprep.subr.bf16.mxu1 %v2380_v8 }
 0x2ed   : > { %2013 = vmatmul.mubr.msk.bf16.vlgmr.msra.gmra.mxu1 %vm603_vm2, %v954_v37 }
 0x2ee   : > { %2026 = vmatprep.mubr.msk.bf16.mxu1 %vm2381_vm1, %v2380_v8 }
 0x395   : > { %v644_v38 = vpop.f32.mrf.mxu1 }
 0x396   : > { %v650_v39 = vsel %vm603_vm2, %v644_v38, -inf }
 0x397   : > { %651 = vmax.xlane.f32.xlu1 %v650_v39  ;;  %v1978_v40 = vpop.f32.mrf.mxu1 }
 0x398   : > { %v1893_v40 = vld [vmem:[%s2833_s7] ss:$0 sm:$0xff] }
 0x399   : > { %v647_v41 = vpop.f32.mrf.mxu1 }
 0x39a   : > { %v2184_v41 = vld [vmem:[%s2835_s9 + $0x8] sm:$0xff]  }
 0x39b   : > { %v1979_v42 = vpop.f32.mrf.mxu1 }
 0x39c   : > { %v1160_v42 = vmul.f32 %v1893_v40, %v2605_v15 }
 0x39d   : > { %v759_v43 = vpop.f32.mrf.mxu1 }
 0x39e   : > { %v765_v44 = vsel %vm603_vm2, %v759_v43, -inf }
 0x39f   : > { %766 = vmax.xlane.f32.xlu0 %v765_v44  ;;  %v1990_v45 = vpop.f32.mrf.mxu1  ;;  %v1894_v44 = vld [vmem:[%s2834_s8] ss:$0 sm:$0xff] }
 0x3a0   : > { %v2185_v45 = vld [vmem:[%s2835_s9] sm:$0xff]  }
 0x3a1   : > { %v762_v46 = vpop.f32.mrf.mxu1 }
 0x3a2   : > { %v1167_v46 = vadd.f32 %v1894_v44, %v1160_v42 }
 0x3a3   : > { %v1991_v47 = vpop.f32.mrf.mxu1 }
 0x3a4   : > { %v1168_v15 = vpack.c.bf16 %v1167_v46, %v1167_v46 }
 0x3a5   : > { %v878_v48 = vpop.f32.mrf.mxu1 }
 0x3a6   : > { %v884_v49 = vsel %vm603_vm2, %v878_v48, -inf }
 0x3a7   : > { %885 = vmax.xlane.f32.xlu1 %v884_v49  ;;  %v2002_v50 = vpop.f32.mrf.mxu1 }
 0x3a9   : > { %v881_v51 = vpop.f32.mrf.mxu1 }
 0x3ab   : > { %v2003_v52 = vpop.f32.mrf.mxu1 }
 0x3ad   : > { %v997_v53 = vpop.f32.mrf.mxu1 }
 0x3ae   : > { %v1003_v54 = vsel %vm603_vm2, %v997_v53, -inf }
 0x3af   : > { %1004 = vmax.xlane.f32.xlu0 %v1003_v54  ;;  %v2014_v55 = vpop.f32.mrf.mxu1 }
 0x3b1   : > { %v1000_v56 = vpop.f32.mrf.mxu1 }
 0x3b3   : > { %v2015_v57 = vpop.f32.mrf.mxu1 }
 0x3b4   : > { %v2186_v57 = vld [vmem:[#allocation7 + $0x8] sm:$0xff]  }
 0x3b5   : > { %2023 = vmatpush3.bf16.msra.mxu1 %v2186_v57 }
 0x3b6   : > { %2024 = vmatprep.subr.bf16.mxu1 %v2380_v8 }
 0x420   : > { %v652_v58 = vpop.xlane.xlu1 %651 }
 0x421   : > { %v653_v59 = vsub.f32 %v644_v38, %v652_v58 }
 0x423   : > { %v654_v60 = vmul.f32 1.442695, %v653_v59  ;;  %v2187_v59 = vld [vmem:[#allocation7] sm:$0xff]  }
 0x424   : > { %2025 = vmatpush3.bf16.msra.mxu1 %v2187_v59 }
 0x425   : > { %2192 = vpow2.f32 %v654_v60  ;;  %2038 = vmatprep.subr.bf16.mxu1 %v2380_v8 }
 0x428   : > { %v767_v61 = vpop.xlane.xlu0 %766 }
 0x429   : > { %v768_v62 = vsub.f32 %v759_v43, %v767_v61 }
 0x42b   : > { %v769_v63 = vmul.f32 1.442695, %v768_v62 }
 0x42d   : > { %2194 = vpow2.f32 %v769_v63 }
 0x430   : > { %v886_v11 = vpop.xlane.xlu1 %885 }
 0x431   : > { %v887_v12 = vsub.f32 %v878_v48, %v886_v11 }
 0x432   : > { %v2193_v1 = vpop.eup %2192 }
 0x433   : > { %v656_v2 = vsel %vm603_vm2, %v2193_v1, 0.0  ;;  %v888_v13 = vmul.f32 1.442695, %v887_v12 }
 0x434   : > { %657 = vadd.xlane.f32.xlu1 %v656_v2 }
 0x438   : > { %v1005_v3 = vpop.xlane.xlu0 %1004 }
 0x439   : > { %v1006_v4 = vsub.f32 %v997_v53, %v1005_v3 }
 0x43a   : > { %v2195_v5 = vpop.eup %2194 }
 0x43b   : > { %v1007_v6 = vmul.f32 1.442695, %v1006_v4  ;;  %v771_v7 = vsel %vm603_vm2, %v2195_v5, 0.0 }
 0x43c   : > { %772 = vadd.xlane.f32.xlu0 %v771_v7 }
 0x43d   : > { %2196 = vpow2.f32 %v1007_v6 }
 0x43e   : > { %2198 = vpow2.f32 %v888_v13 }
 0x445   : > { %662 = vrot.lane.b32.xlu1 %v2614_v22, %s2389_s20 }
 0x44a   : > { %v2197_v9 = vpop.eup %2196 }
 0x44b   : > { %v1009_v10 = vsel %vm603_vm2, %v2197_v9, 0.0  ;;  %v2199_v14 = vpop.eup %2198 }
 0x44c   : > { %1010 = vadd.xlane.f32.xlu0 %v1009_v10  ;;  %v890_v16 = vsel %vm603_vm2, %v2199_v14, 0.0 }
 0x462   : > { %777 = vrot.lane.b32.xlu0 %v2614_v22, %s2845_s4  ;;  %s2393_s4 = smov 8  }
 0x469   : > { %891 = vadd.xlane.f32.xlu1 %v890_v16 }
 0x47a   : > { %896 = vrot.lane.b32.xlu1 %v2614_v22, %s2844_s28  ;;  %s2394_s28 = smov 16  }
 0x47e   : > { %1015 = vrot.lane.b32.xlu1 %v2614_v22, %s2843_s16  ;;  %s2395_s16 = smov 24  }
 0x4bd   : > { %v658_v17 = vpop.xlane.xlu1 %657 }
 0x4be   : > { %2200 = vrcp.f32 %v658_v17 }
 0x4c1   : > { %v663_v18 = vpop.permute.xlu1 %662 }
 0x4c2   : > { %v669_v19 = vsel %vm667_vm3, %v663_v18, 0 }
 0x4c3   : > { %1981 = vmatpush3.bf16.msra.mxu0 %v669_v19 }
 0x4c4   : > { %1992 = vmatprep.subr.bf16.mxu0 %v2380_v8 }
 0x4c5   : > { %v773_v20 = vpop.xlane.xlu0 %772 }
 0x4c6   : > { %2202 = vrcp.f32 %v773_v20 }
 0x4cb   : > { %v2201_v21 = vpop.eup %2200 }
 0x4cc   : > { %v660_v23 = vmul.f32 %v2201_v21, %v2193_v1 }
 0x4ce   : > { %v661_v24 = vpack.c.bf16 %v660_v23, %v660_v23 }
 0x4d0   : > { %1983 = vmatmul.mubr.msk.bf16.vlgmr.msra.gmra.mxu0 %vm603_vm2, %v661_v24 }
 0x4d1   : > { %1994 = vmatprep.mubr.msk.bf16.mxu0 %vm2381_vm1, %v2380_v8 }
 0x4d3   : > { %v2203_v22 = vpop.eup %2202 }
 0x4d4   : > { %v775_v26 = vmul.f32 %v2203_v22, %v2195_v5 }
 0x4d5   : > { %v1011_v25 = vpop.xlane.xlu0 %1010 }
 0x4d6   : > { %v776_v29 = vpack.c.bf16 %v775_v26, %v775_v26 }
 0x4d9   : > { %v778_v27 = vpop.permute.xlu0 %777 }
 0x4da   : > { %v783_v28 = vsel %vm667_vm3, %v778_v27, 0 }
 0x4db   : > { %1993 = vmatpush3.bf16.msra.mxu0 %v783_v28 }
 0x4dc   : > { %2004 = vmatprep.subr.bf16.mxu0 %v2380_v8 }
 0x4de   : > { %1995 = vmatmul.mubr.msk.bf16.vlgmr.msra.gmra.mxu0 %vm603_vm2, %v776_v29 }
 0x4df   : > { %2006 = vmatprep.mubr.msk.bf16.mxu0 %vm2381_vm1, %v2380_v8 }
 0x4f2   : > { %v892_v30 = vpop.xlane.xlu1 %891 }
 0x4f3   : > { %2204 = vrcp.f32 %v892_v30 }
 0x4f4   : > { %2206 = vrcp.f32 %v1011_v25 }
 0x4f6   : > { %v897_v31 = vpop.permute.xlu1 %896 }
 0x4f7   : > { %v902_v32 = vsel %vm667_vm3, %v897_v31, 0 }
 0x4f8   : > { %2005 = vmatpush3.bf16.msra.mxu0 %v902_v32 }
 0x4f9   : > { %2016 = vmatprep.subr.bf16.mxu0 %v2380_v8 }
 0x4fa   : > { %v1016_v35 = vpop.permute.xlu1 %1015 }
 0x4fb   : > { %v1021_v38 = vsel %vm667_vm3, %v1016_v35, 0 }
 0x500   : > { %v2205_v33 = vpop.eup %2204 }
 0x501   : > { %v894_v34 = vmul.f32 %v2205_v33, %v2199_v14  ;;  %v2207_v37 = vpop.eup %2206 }
 0x502   : > { %v1013_v39 = vmul.f32 %v2207_v37, %v2197_v9 }
 0x503   : > { %v895_v36 = vpack.c.bf16 %v894_v34, %v894_v34 }
 0x504   : > { %v1014_v43 = vpack.c.bf16 %v1013_v39, %v1013_v39 }
 0x505   : > { %2007 = vmatmul.mubr.msk.bf16.vlgmr.msra.gmra.mxu0 %vm603_vm2, %v895_v36 }
 0x506   : > { %2017 = vmatpush3.bf16.msra.mxu0 %v1021_v38  ;;  %2018 = vmatprep.mubr.msk.bf16.mxu0 %vm2381_vm1, %v2380_v8 }
 0x507   : > { %2030 = vmatprep.subr.bf16.mxu0 %v2380_v8 }
 0x50d   : > { %2019 = vmatmul.mubr.msk.bf16.vlgmr.msra.gmra.mxu0 %vm603_vm2, %v1014_v43 }
 0x50e   : > { %2031 = vmatpush3.bf16.msra.mxu0 %v2184_v41  ;;  %2034 = vmatprep.mubr.msk.bf16.mxu0 %vm2381_vm1, %v2380_v8 }
 0x50f   : > { %2032 = vmatprep.subr.bf16.mxu0 %v2380_v8 }
 0x512   : > { %2033 = vmatpush3.bf16.msra.mxu0 %v2185_v45 }
 0x513   : > { %2044 = vmatprep.subr.bf16.mxu0 %v2380_v8 }
 0x515   : > { %2035 = vmatmul.mubr.msk.bf16.vlgmr.msra.gmra.mxu0 %vm512_vm0, %v1168_v15 }
 0x516   : > { %2046 = vmatprep.mubr.msk.bf16.mxu0 %vm2381_vm1, %v2380_v8 }
 0x590   : > { %v705_v47 = vpop.f32.mrf.mxu0 }
 0x591   : > { %v711_v48 = vpack.c.bf16 %v705_v47, %v705_v47 }
 0x592   : > { %v1984_v49 = vpop.f32.mrf.mxu0 }
 0x593   : > { %713 = vst.msk [vmem:[#allocation2] sm:$0xf] %vm712_vm4, %v711_v48 }
 0x594   : > { %v708_v50 = vpop.f32.mrf.mxu0 }
 0x596   : > { %v1985_v51 = vpop.f32.mrf.mxu0 }
 0x59e   : > { %v819_v52 = vpop.f32.mrf.mxu0 }
 0x59f   : > { %v1916_v53 = vpack.c.bf16 %v819_v52, %v819_v52 }
 0x5a0   : > { %v1996_v54 = vpop.f32.mrf.mxu0 }
 0x5a1   : > { %829 = vrot.lane.b32.xlu0 %v1916_v53, %s2393_s4 }
 0x5a2   : > { %v822_v55 = vpop.f32.mrf.mxu0 }
 0x5a4   : > { %v1997_v56 = vpop.f32.mrf.mxu0 }
 0x5c5   : > { %v938_v58 = vpop.f32.mrf.mxu0 }
 0x5c6   : > { %v1917_v60 = vpack.c.bf16 %v938_v58, %v938_v58 }
 0x5c7   : > { %v2008_v61 = vpop.f32.mrf.mxu0 }
 0x5c8   : > { %948 = vrot.lane.b32.xlu1 %v1917_v60, %s2394_s28 }
 0x5c9   : > { %v941_v62 = vpop.f32.mrf.mxu0 }
 0x5cb   : > { %v2009_v63 = vpop.f32.mrf.mxu0 }
 0x5cd   : > { %v1057_v1 = vpop.f32.mrf.mxu0 }
 0x5ce   : > { %v1918_v2 = vpack.c.bf16 %v1057_v1, %v1057_v1 }
 0x5cf   : > { %v2020_v3 = vpop.f32.mrf.mxu0 }
 0x5d0   : > { %1067 = vrot.lane.b32.xlu0 %v1918_v2, %s2395_s16 }
 0x5d1   : > { %v1060_v4 = vpop.f32.mrf.mxu0 }
 0x5d3   : > { %v2021_v5 = vpop.f32.mrf.mxu0 }
 0x5d5   : > { %v1218_v6 = vpop.f32.mrf.mxu0 }
 0x5d6   : > { %v1224_v7 = vmul.f32 0.35355338, %v1218_v6  ;;  %v2707_v9 = vpack.c.bf16 %v1218_v6, %v1218_v6 }
 0x5d7   : > { %v2036_v10 = vpop.f32.mrf.mxu0 }
 0x5d8   : > { %1341 = vrot.lane.b32.xlu0 %v2707_v9, %s2384_s23  ;;  %1228 = vrot.lane.b32.xlu1 %v2707_v9, %s2382_s17  ;;  %v1225_v12 = vpack.c.bf16 %v1224_v7, %v1224_v7  ;;  %s2863_s17 = smov 56   ;;  %s2865_s23 = smov 40  }
 0x5d9   : > { %v1221_v11 = vpop.f32.mrf.mxu0 }
 0x5db   : > { %v2037_v13 = vpop.f32.mrf.mxu0 }
 0x5dc   : > { %1459 = vrot.lane.b32.xlu0 %v2707_v9, %s2385_s24  ;;  %1339 = vrot.lane.b32.xlu1 %v1225_v12, %s2383_s18  ;;  %s2864_s18 = smov 48  }
 0x5e0   : > { %1577 = vrot.lane.b32.xlu0 %v2707_v9, %s2387_s22  ;;  %1457 = vrot.lane.b32.xlu1 %v1225_v12, %s2386_s15 }
 0x5e4   : > { %1575 = vrot.lane.b32.xlu1 %v1225_v12, %s2388_s21 }
 0x613   : > { %v830_v14 = vpop.permute.xlu0 %829 }
 0x614   : > { %833 = vst.msk [vmem:[#allocation2] sm:$0xf] %vm832_vm5, %v830_v14 }
 0x63a   : > { %v949_v16 = vpop.permute.xlu1 %948 }
 0x63b   : > { %952 = vst.msk [vmem:[#allocation2] sm:$0xf] %vm951_vm6, %v949_v16 }
 0x642   : > { %v1068_v17 = vpop.permute.xlu0 %1067 }
 0x643   : > { %1071 = vst.msk [vmem:[#allocation2] sm:$0xf] %vm1070_vm7, %v1068_v17 }
 0x64a   : > { %v1229_v18 = vpop.permute.xlu1 %1228  ;;  %v1072_v19 = vld [vmem:[#allocation2] sm:$0xf]  ;;  %v1342_v21 = vpop.permute.xlu0 %1341 }
 0x64b   : > { %v1234_v20 = vsel %vm603_vm2, %v1229_v18, 0  ;;  %2027 = vmatmul.mubr.msk.bf16.vlgmr.msra.gmra.mxu1 %vm512_vm0, %v1072_v19  ;;  %v1347_v23 = vsel %vm603_vm2, %v1342_v21, 0 }
 0x64c   : > { %2039 = vmatpush3.bf16.xpose.msra.mxu1 %v1234_v20  ;;  %2040 = vmatprep.mubr.msk.bf16.mxu1 %vm2381_vm1, %v2380_v8 }
 0x64d   : > { %2050 = vmatprep.subr.bf16.mxu1 %v2380_v8 }
 0x64e   : > { %v1460_v24 = vpop.permute.xlu0 %1459  ;;  %v1340_v22 = vpop.permute.xlu1 %1339 }
 0x64f   : > { %v1465_v25 = vsel %vm603_vm2, %v1460_v24, 0 }
 0x652   : > { %v1578_v26 = vpop.permute.xlu0 %1577  ;;  %v1458_v27 = vpop.permute.xlu1 %1457 }
 0x653   : > { %2041 = vmatmul.mubr.msk.bf16.vlgmr.msra.gmra.mxu1 %vm603_vm2, %v1225_v12  ;;  %v1583_v28 = vsel %vm603_vm2, %v1578_v26, 0 }
 0x654   : > { %2051 = vmatpush3.bf16.xpose.msra.mxu1 %v1347_v23  ;;  %2052 = vmatprep.mubr.msk.bf16.mxu1 %vm2381_vm1, %v2380_v8 }
 0x655   : > { %2062 = vmatprep.subr.bf16.mxu1 %v2380_v8 }
 0x656   : > { %v1576_v29 = vpop.permute.xlu1 %1575 }
 0x65b   : > { %2053 = vmatmul.mubr.msk.bf16.vlgmr.msra.gmra.mxu1 %vm603_vm2, %v1340_v22 }
 0x65c   : > { %2063 = vmatpush3.bf16.xpose.msra.mxu1 %v1465_v25  ;;  %2064 = vmatprep.mubr.msk.bf16.mxu1 %vm2381_vm1, %v2380_v8 }
 0x65d   : > { %2074 = vmatprep.subr.bf16.mxu1 %v2380_v8 }
 0x663   : > { %2065 = vmatmul.mubr.msk.bf16.vlgmr.msra.gmra.mxu1 %vm603_vm2, %v1458_v27 }
 0x664   : > { %2075 = vmatpush3.bf16.xpose.msra.mxu1 %v1583_v28  ;;  %2076 = vmatprep.mubr.msk.bf16.mxu1 %vm2381_vm1, %v2380_v8 }
 0x665   : > { %2086 = vmatprep.subr.bf16.mxu1 %v2380_v8 }
 0x66b   : > { %2077 = vmatmul.mubr.msk.bf16.vlgmr.msra.gmra.mxu1 %vm603_vm2, %v1576_v29 }
 0x66c   : > { %2090 = vmatprep.mubr.msk.bf16.mxu1 %vm2381_vm1, %v2380_v8 }
 0x70b   : > { %v2746_v30 = vpop.f32.mrf.mxu1 }
 0x70d   : > { %v2028_v31 = vpop.f32.mrf.mxu1 }
 0x70f   : > { %v1131_v32 = vpop.f32.mrf.mxu1 }
 0x711   : > { %v2029_v33 = vpop.f32.mrf.mxu1 }
 0x713   : > { %v1270_v34 = vpop.f32.mrf.mxu1 }
 0x714   : > { %v1276_v35 = vsel %vm603_vm2, %v1270_v34, -inf }
 0x715   : > { %1277 = vmax.xlane.f32.xlu0 %v1276_v35  ;;  %v2042_v36 = vpop.f32.mrf.mxu1 }
 0x717   : > { %v1273_v37 = vpop.f32.mrf.mxu1 }
 0x719   : > { %v2043_v38 = vpop.f32.mrf.mxu1 }
 0x71b   : > { %v1383_v39 = vpop.f32.mrf.mxu1 }
 0x71c   : > { %v1389_v40 = vsel %vm603_vm2, %v1383_v39, -inf }
 0x71d   : > { %1390 = vmax.xlane.f32.xlu1 %v1389_v40  ;;  %v2054_v41 = vpop.f32.mrf.mxu1 }
 0x71f   : > { %v1386_v42 = vpop.f32.mrf.mxu1 }
 0x721   : > { %v2055_v43 = vpop.f32.mrf.mxu1 }
 0x723   : > { %v1501_v44 = vpop.f32.mrf.mxu1 }
 0x724   : > { %v1507_v45 = vsel %vm603_vm2, %v1501_v44, -inf }
 0x725   : > { %1508 = vmax.xlane.f32.xlu0 %v1507_v45  ;;  %v2066_v46 = vpop.f32.mrf.mxu1 }
 0x727   : > { %v1504_v15 = vpop.f32.mrf.mxu1 }
 0x728   : > { %v2188_v15 = vld [vmem:[%s2836_s10 + $0x8] sm:$0xff]  }
 0x729   : > { %v2067_v47 = vpop.f32.mrf.mxu1  ;;  %2087 = vmatpush3.bf16.msra.mxu1 %v2188_v15 }
 0x72a   : > { %2088 = vmatprep.subr.bf16.mxu1 %v2380_v8 }
 0x72b   : > { %v1619_v48 = vpop.f32.mrf.mxu1 }
 0x72c   : > { %v1625_v49 = vsel %vm603_vm2, %v1619_v48, -inf }
 0x72d   : > { %1626 = vmax.xlane.f32.xlu0 %v1625_v49  ;;  %v2078_v50 = vpop.f32.mrf.mxu1 }
 0x72f   : > { %v1622_v51 = vpop.f32.mrf.mxu1 }
 0x731   : > { %v2079_v52 = vpop.f32.mrf.mxu1 }
 0x79e   : > { %v1278_v53 = vpop.xlane.xlu0 %1277 }
 0x79f   : > { %v1279_v54 = vsub.f32 %v1270_v34, %v1278_v53 }
 0x7a1   : > { %v1280_v55 = vmul.f32 1.442695, %v1279_v54 }
 0x7a3   : > { %2208 = vpow2.f32 %v1280_v55 }
 0x7a6   : > { %v1391_v56 = vpop.xlane.xlu1 %1390 }
 0x7a7   : > { %v1392_v57 = vsub.f32 %v1383_v39, %v1391_v56 }
 0x7a9   : > { %v1393_v58 = vmul.f32 1.442695, %v1392_v57 }
 0x7ab   : > { %2210 = vpow2.f32 %v1393_v58 }
 0x7ae   : > { %v1509_v61 = vpop.xlane.xlu0 %1508 }
 0x7af   : > { %v1510_v6 = vsub.f32 %v1501_v44, %v1509_v61  ;;  %v1888_v61 = vld [vmem:[#allocation8] ss:$0 sm:$0xff] }
 0x7b0   : > { %v2209_v59 = vpop.eup %2208 }
 0x7b1   : > { %v1282_v60 = vsel %vm603_vm2, %v2209_v59, 0.0  ;;  %v1511_v7 = vmul.f32 1.442695, %v1510_v6 }
 0x7b2   : > { %1283 = vadd.xlane.f32.xlu1 %v1282_v60 }
 0x7b6   : > { %v1627_v62 = vpop.xlane.xlu0 %1626 }
 0x7b7   : > { %v1628_v63 = vsub.f32 %v1619_v48, %v1627_v62  ;;  %v2189_v48 = vld [vmem:[%s2836_s10] sm:$0xff]   ;;  %v1129_v62 = vadd.f32 %v1888_v61, %v2746_v30 }
 0x7b8   : > { %v2211_v1 = vpop.eup %2210  ;;  %2089 = vmatpush3.bf16.msra.mxu1 %v2189_v48 }
 0x7b9   : > { %v1629_v2 = vmul.f32 1.442695, %v1628_v63  ;;  %v1395_v3 = vsel %vm603_vm2, %v2211_v1, 0.0  ;;  %v1892_v63 = vld [vmem:[%s2832_s6] ss:$0 sm:$0xff] }
 0x7ba   : > { %1396 = vadd.xlane.f32.xlu0 %v1395_v3  ;;  %v1913_v3 = vld [vmem:[%s2838_s12] ss:$0 sm:$0xff] }
 0x7bb   : > { %2212 = vpow2.f32 %v1629_v2  ;;  %v1140_v2 = vmul.f32 %v1892_v63, %v1129_v62 }
 0x7bc   : > { %2214 = vpow2.f32 %v1511_v7 }
 0x7bd   : > { %v1141_v30 = vadd.f32 %v1140_v2, %v2588_v0 }
 0x7c3   : > { %1288 = vrot.lane.b32.xlu1 %v2707_v9, %s2389_s20 }
 0x7c8   : > { %v2213_v4 = vpop.eup %2212 }
 0x7c9   : > { %v1631_v5 = vsel %vm603_vm2, %v2213_v4, 0.0  ;;  %v2215_v10 = vpop.eup %2214 }
 0x7ca   : > { %1632 = vadd.xlane.f32.xlu0 %v1631_v5  ;;  %v1513_v11 = vsel %vm603_vm2, %v2215_v10, 0.0 }
 0x7e0   : > { %1401 = vrot.lane.b32.xlu0 %v2707_v9, %s2863_s17 }
 0x7e7   : > { %1514 = vadd.xlane.f32.xlu1 %v1513_v11 }
 0x7f8   : > { %1519 = vrot.lane.b32.xlu1 %v2707_v9, %s2864_s18 }
 0x7fc   : > { %1637 = vrot.lane.b32.xlu1 %v2707_v9, %s2865_s23 }
 0x83b   : > { %v1284_v12 = vpop.xlane.xlu1 %1283 }
 0x83c   : > { %2216 = vrcp.f32 %v1284_v12 }
 0x83f   : > { %v1289_v13 = vpop.permute.xlu1 %1288 }
 0x840   : > { %v1294_v14 = vsel %vm667_vm3, %v1289_v13, 0 }
 0x841   : > { %2045 = vmatpush3.bf16.msra.mxu0 %v1294_v14 }
 0x842   : > { %2056 = vmatprep.subr.bf16.mxu0 %v2380_v8 }
 0x843   : > { %v1397_v16 = vpop.xlane.xlu0 %1396 }
 0x844   : > { %2218 = vrcp.f32 %v1397_v16 }
 0x849   : > { %v2217_v17 = vpop.eup %2216 }
 0x84a   : > { %v1286_v18 = vmul.f32 %v2217_v17, %v2209_v59 }
 0x84c   : > { %v1287_v19 = vpack.c.bf16 %v1286_v18, %v1286_v18 }
 0x84e   : > { %2047 = vmatmul.mubr.msk.bf16.vlgmr.msra.gmra.mxu0 %vm603_vm2, %v1287_v19 }
 0x84f   : > { %2058 = vmatprep.mubr.msk.bf16.mxu0 %vm2381_vm1, %v2380_v8 }
 0x851   : > { %v2219_v20 = vpop.eup %2218 }
 0x852   : > { %v1399_v21 = vmul.f32 %v2219_v20, %v2211_v1  ;;  %v1909_v1 = vld [vmem:[%s2837_s11] ss:$0 sm:$0xff] }
 0x853   : > { %v1633_v9 = vpop.xlane.xlu0 %1632 }
 0x854   : > { %v1400_v22 = vpack.c.bf16 %v1399_v21, %v1399_v21 }
 0x857   : > { %v1402_v23 = vpop.permute.xlu0 %1401 }
 0x858   : > { %v1407_v24 = vsel %vm667_vm3, %v1402_v23, 0 }
 0x859   : > { %2057 = vmatpush3.bf16.msra.mxu0 %v1407_v24 }
 0x85a   : > { %2068 = vmatprep.subr.bf16.mxu0 %v2380_v8 }
 0x85c   : > { %2059 = vmatmul.mubr.msk.bf16.vlgmr.msra.gmra.mxu0 %vm603_vm2, %v1400_v22 }
 0x85d   : > { %2070 = vmatprep.mubr.msk.bf16.mxu0 %vm2381_vm1, %v2380_v8 }
 0x870   : > { %v1515_v25 = vpop.xlane.xlu1 %1514 }
 0x871   : > { %2220 = vrcp.f32 %v1515_v25 }
 0x872   : > { %2222 = vrcp.f32 %v1633_v9 }
 0x874   : > { %v1520_v26 = vpop.permute.xlu1 %1519 }
 0x875   : > { %v1525_v27 = vsel %vm667_vm3, %v1520_v26, 0 }
 0x876   : > { %2069 = vmatpush3.bf16.msra.mxu0 %v1525_v27 }
 0x877   : > { %2080 = vmatprep.subr.bf16.mxu0 %v2380_v8 }
 0x878   : > { %v1638_v31 = vpop.permute.xlu1 %1637 }
 0x879   : > { %v1643_v34 = vsel %vm667_vm3, %v1638_v31, 0 }
 0x87e   : > { %v2221_v28 = vpop.eup %2220 }
 0x87f   : > { %v1517_v29 = vmul.f32 %v2221_v28, %v2215_v10  ;;  %v2223_v33 = vpop.eup %2222 }
 0x880   : > { %v1635_v35 = vmul.f32 %v2223_v33, %v2213_v4 }
 0x881   : > { %v1518_v32 = vpack.c.bf16 %v1517_v29, %v1517_v29 }
 0x882   : > { %v1636_v36 = vpack.c.bf16 %v1635_v35, %v1635_v35 }
 0x883   : > { %2071 = vmatmul.mubr.msk.bf16.vlgmr.msra.gmra.mxu0 %vm603_vm2, %v1518_v32 }
 0x884   : > { %2081 = vmatpush3.bf16.msra.mxu0 %v1643_v34  ;;  %2082 = vmatprep.mubr.msk.bf16.mxu0 %vm2381_vm1, %v2380_v8 }
 0x88b   : > { %2083 = vmatmul.mubr.msk.bf16.vlgmr.msra.gmra.mxu0 %vm603_vm2, %v1636_v36 }
 0x90e   : > { %v1330_v37 = vpop.f32.mrf.mxu0 }
 0x90f   : > { %v1336_v38 = vpack.c.bf16 %v1330_v37, %v1330_v37 }
 0x910   : > { %v2048_v39 = vpop.f32.mrf.mxu0 }
 0x911   : > { %1337 = vst.msk [vmem:[#allocation2] sm:$0xf] %vm712_vm4, %v1336_v38 }
 0x912   : > { %v1333_v40 = vpop.f32.mrf.mxu0 }
 0x914   : > { %v2049_v41 = vpop.f32.mrf.mxu0 }
 0x91c   : > { %v1443_v42 = vpop.f32.mrf.mxu0 }
 0x91d   : > { %v1919_v43 = vpack.c.bf16 %v1443_v42, %v1443_v42 }
 0x91e   : > { %v2060_v44 = vpop.f32.mrf.mxu0 }
 0x91f   : > { %1453 = vrot.lane.b32.xlu0 %v1919_v43, %s2393_s4  ;;  %s1871_s4 = sshll.u32 %s2872_s29, 3 }
 0x920   : > { %v1446_v45 = vpop.f32.mrf.mxu0  ;;  %s497_s17 = scalar_lea.vmem %s2839_s13, %s1871_s4 }
 0x922   : > { %v2061_v46 = vpop.f32.mrf.mxu0 }
 0x943   : > { %v1561_v47 = vpop.f32.mrf.mxu0 }
 0x944   : > { %v1920_v49 = vpack.c.bf16 %v1561_v47, %v1561_v47 }
 0x945   : > { %v2072_v50 = vpop.f32.mrf.mxu0 }
 0x946   : > { %1571 = vrot.lane.b32.xlu1 %v1920_v49, %s2394_s28 }
 0x947   : > { %v1564_v51 = vpop.f32.mrf.mxu0 }
 0x949   : > { %v2073_v52 = vpop.f32.mrf.mxu0 }
 0x94b   : > { %v1679_v53 = vpop.f32.mrf.mxu0 }
 0x94c   : > { %v1921_v54 = vpack.c.bf16 %v1679_v53, %v1679_v53 }
 0x94d   : > { %v2084_v55 = vpop.f32.mrf.mxu0 }
 0x94e   : > { %1689 = vrot.lane.b32.xlu0 %v1921_v54, %s2395_s16 }
 0x94f   : > { %v1682_v56 = vpop.f32.mrf.mxu0 }
 0x951   : > { %v2085_v57 = vpop.f32.mrf.mxu0 }
 0x991   : > { %v1454_v58 = vpop.permute.xlu0 %1453 }
 0x992   : > { %1456 = vst.msk [vmem:[#allocation2] sm:$0xf] %vm832_vm5, %v1454_v58 }
 0x9b8   : > { %v1572_v59 = vpop.permute.xlu1 %1571 }
 0x9b9   : > { %1574 = vst.msk [vmem:[#allocation2] sm:$0xf] %vm951_vm6, %v1572_v59 }
 0x9c0   : > { %v1690_v8 = vpop.permute.xlu0 %1689 }
 0x9c1   : > { %1692 = vst.msk [vmem:[#allocation2] sm:$0xf] %vm1070_vm7, %v1690_v8 }
 0x9c8   : > { %v1693_v60 = vld [vmem:[#allocation2] sm:$0xf] }
 0x9c9   : > { %2091 = vmatmul.mubr.msk.bf16.vlgmr.msra.gmra.mxu1 %vm512_vm0, %v1693_v60 }
 0xa89   : > { %v1749_v4 = vpop.f32.mrf.mxu1 }
 0xa8a   : > { %v1750_v5 = vadd.f32 %v1909_v1, %v1749_v4 }
 0xa8b   : > { %v2092_v6 = vpop.f32.mrf.mxu1 }
 0xa8c   : > { %v1761_v7 = vmul.f32 %v1913_v3, %v1750_v5 }
 0xa8d   : > { %v1752_v10 = vpop.f32.mrf.mxu1 }
 0xa8e   : > { %v1762_v11 = vadd.f32 %v1761_v7, %v1141_v30 }
 0xa8f   : > { %v2093_v12 = vpop.f32.mrf.mxu1 }
 0xa90   : > { %1763 = vst.msk [vmem:[%s497_s17] sm:$0xff] %vm512_vm0, %v1762_v11 }
 0xa91 PF: > { %s2866_s18 = sld [smem:[#allocation13_spill]]  ;;  %p25_p8 = scmp.ge.s32.totalorder %s2536_s19, 4  }
 0xa92   : > { %s2867_s25 = smov %s2364_s26  ;;  %s2868_s26 = smov %s2368_s27 }
 0xa93   : > { %s2870_s28 = smov %s2536_s19  ;;  %27 = sbr.rel (!%p25_p8) target bundleno = 9 (0x9), region = 124 }
 0xa97   : > { %s2869_s27 = smov %s2866_s18 }
 0xa98   :  { %1783 = vsyncpa [#allocation4], 1 }
 0xa99   :  { %1785 = vsyncpa [#allocation4 + $0x1], 1 }
 0xa9a   :  { %1786 = vsyncpa [#allocation6], 1 }
 0xa9b   :  { %1787 = vsyncpa [#allocation9], 1 }

</bundles_post_ra>
